<compile_context>
chip_gen: v6e
topology: v6e:2x2x1
jax: 0.10.0
libtpu: 0.0.40
codegen_flags: <defaults>
</compile_context>

<pallas_src>
import jax
import jax.numpy as jnp
from jax.experimental import pallas as pl
from jax.experimental.pallas import tpu as pltpu

LATENT = 29
IN_DIM = LATENT + 3            # 32
HIDDEN = (64, 64, 64, 64)
LATENT_IN = (2,)
OUT_DIM = 2
EPS = 1e-5                     # nn.LayerNorm default eps


def _linear_shapes():
    """Replicates the dims bookkeeping of dsdfDecoder.__init__ -> [(in, out)]."""
    dims = [IN_DIM] + list(HIDDEN) + [OUT_DIM]
    shapes = []
    for layer in range(len(dims) - 1):
        if layer + 1 in LATENT_IN:
            out_d = dims[layer + 1] - dims[0]
        else:
            out_d = dims[layer + 1]
        shapes.append((dims[layer], out_d))
    return shapes


# ---------------------------------------------------------------------------
# Kernel
# ---------------------------------------------------------------------------
def _ln_relu(h, v_ref):
    """bias-add + LayerNorm + ReLU on an (out_features, tile_n) f32 block.

    v_ref packs [linear bias | LN gamma | LN beta] as columns: (out, 3).
    var = E[h^2] - mu^2 keeps the two feature reductions independent
    (avoids the reduce -> elementwise -> reduce serial chain).
    """
    b = v_ref[:, 0:1]
    g = v_ref[:, 1:2]
    be = v_ref[:, 2:3]
    h = h + b
    inv_d = 1.0 / h.shape[0]
    mu = jnp.sum(h, axis=0, keepdims=True) * inv_d            # (1, tile_n)
    ex2 = jnp.sum(h * h, axis=0, keepdims=True) * inv_d       # (1, tile_n)
    var = jnp.maximum(ex2 - mu * mu, 0.0)
    r = jax.lax.rsqrt(var + EPS)                              # EUP
    return jnp.maximum((h - mu) * r * g + be, 0.0)


def dsdf_kernel(x_ref,
                w0, v0, w1, v1, w2h, w2x, v2, w3, v3, w4, b4,
                out_ref):
    f32 = jnp.float32
    bf16 = jnp.bfloat16
    xT = x_ref[...]                                           # (32, TN) bf16

    # layer 0: Linear(32->64) + LayerNorm + ReLU
    h = jnp.dot(w0[...], xT, preferred_element_type=f32)
    h = _ln_relu(h, v0)

    # layer 1: Linear(64->32) + LayerNorm + ReLU
    h = jnp.dot(w1[...], h.astype(bf16), preferred_element_type=f32)
    h = _ln_relu(h, v1)

    # layer 2: latent_in -> cat([h, input]) @ W2.T, done as split matmuls
    h = (jnp.dot(w2h[...], h.astype(bf16), preferred_element_type=f32) +
         jnp.dot(w2x[...], xT, preferred_element_type=f32))
    h = _ln_relu(h, v2)

    # layer 3: Linear(64->64) + LayerNorm + ReLU
    h = jnp.dot(w3[...], h.astype(bf16), preferred_element_type=f32)
    h = _ln_relu(h, v3)

    # layer 4 (final): Linear(64->2), then self.th tanh
    o = jnp.dot(w4[...], h.astype(bf16), preferred_element_type=f32) + b4[...]
    out_ref[...] = jnp.tanh(o).astype(out_ref.dtype)          # (2, TN) lane-dense


# ---------------------------------------------------------------------------
# Wrapper
# ---------------------------------------------------------------------------
def _round_up(v, m):
    return (v + m - 1) // m * m


def _pick_tile(n, tile_max):
    n128 = _round_up(max(n, 1), 128)
    tile = min(_round_up(tile_max, 128), n128)
    # Prefer >= 2 grid steps so the "parallel" axis can shard across the two
    # TensorCores of a v7x chip whenever there is enough work.
    if n128 >= 256 and n128 // tile < 2:
        tile = _round_up(n128 // 2, 128)
    return max(tile, 128)


def _pack_params(params):
    """PyTorch-layout params -> kernel operands.

    params = [W0,b0,g0,be0, W1,b1,g1,be1, W2,b2,g2,be2, W3,b3,g3,be3, W4,b4]
    with W (out, in) and 1-D vectors.  Weights -> bf16 (MXU operands); the
    small vectors are packed as (out, 3) = [bias | gamma | beta] columns and
    W2 is pre-split along its input dim for the latent_in concat.
    """
    (W0, b0, g0, be0, W1, b1, g1, be1, W2, b2, g2, be2,
     W3, b3, g3, be3, W4, b4) = params
    bf16, f32 = jnp.bfloat16, jnp.float32
    split = _linear_shapes()[1][1]        # width of h entering layer 2 (= 32)

    def vec(b, g, be):
        return jnp.stack([b, g, be], axis=1).astype(f32)      # (out, 3)

    return [
        W0.astype(bf16), vec(b0, g0, be0),
        W1.astype(bf16), vec(b1, g1, be1),
        W2[:, :split].astype(bf16), W2[:, split:].astype(bf16), vec(b2, g2, be2),
        W3.astype(bf16), vec(b3, g3, be3),
        W4.astype(bf16), b4.reshape(-1, 1).astype(f32),
    ]


def dsdf_decoder(x, params, *, tile_n=2048):
    """x: (N, latent+3) -> (sdf0, sdf1), each (N, 1). Matches module.forward."""
    N, F = x.shape
    assert F == IN_DIM
    kparams = _pack_params(params)

    tile = _pick_tile(N, tile_n)
    n_pad = _round_up(N, tile)

    # Batch-on-lanes: pass the input transposed (features on sublanes, batch on
    # lanes) in bf16 -- halves the dominant HBM stream and fills all 128 lanes.
    xT = x.astype(jnp.bfloat16).T                             # (32, N)
    if n_pad != N:
        xT = jnp.pad(xT, ((0, 0), (0, n_pad - N)))

    in_specs = [pl.BlockSpec((IN_DIM, tile), lambda i: (0, i))]
    # Grid-invariant parameter blocks (constant index map -> DMA'd once).
    in_specs += [pl.BlockSpec(p.shape, lambda i: (0, 0)) for p in kparams]

    out = pl.pallas_call(
        dsdf_kernel,
        out_shape=jax.ShapeDtypeStruct((OUT_DIM, n_pad), jnp.float32),
        grid_spec=pltpu.PrefetchScalarGridSpec(
            num_scalar_prefetch=0,
            grid=(n_pad // tile,),
            in_specs=in_specs,
            out_specs=pl.BlockSpec((OUT_DIM, tile), lambda i: (0, i)),
        ),
        compiler_params=pltpu.CompilerParams(
            dimension_semantics=("parallel",),
            vmem_limit_bytes=32 * 1024 * 1024,
        ),
    )(xT, *kparams)

    out = out[:, :N]                      # drop batch padding; (2, N)
    # module returns (x[:, 0].unsqueeze(1), x[:, 1].unsqueeze(1))
    return out[0, :, None], out[1, :, None]


# ---------------------------------------------------------------------------
# Params + pure-JAX reference
# ---------------------------------------------------------------------------
def init_params(key):
    """nn.Linear default init (uniform +-1/sqrt(fan_in)); LayerNorm weight=1,
    bias=0.  Weights stored PyTorch-style (out, in); vectors are 1-D."""
    shapes = _linear_shapes()
    params = []
    for li, (d_in, d_out) in enumerate(shapes):
        key, kw, kb = jax.random.split(key, 3)
        bound = 1.0 / (d_in ** 0.5)
        W = jax.random.uniform(kw, (d_out, d_in), jnp.float32, -bound, bound)
        b = jax.random.uniform(kb, (d_out,), jnp.float32, -bound, bound)
        params.extend([W, b])
        if li < len(shapes) - 1:           # norm_layers = all hidden layers
            params.extend([jnp.ones((d_out,), jnp.float32),
                           jnp.zeros((d_out,), jnp.float32)])
    return params


def ref_forward(x, params):
    """Pure-JAX reference of the PyTorch forward (eval mode), mirroring the
    kernel's bf16 matmul operands with f32 accumulation."""
    (W0, b0, g0, be0, W1, b1, g1, be1, W2, b2, g2, be2,
     W3, b3, g3, be3, W4, b4) = params
    bf16 = jnp.bfloat16

    def lin(h, W, b):
        return jnp.dot(h.astype(bf16), W.astype(bf16).T,
                       preferred_element_type=jnp.float32) + b

    def ln(h, g, be):
        mu = h.mean(-1, keepdims=True)
        var = ((h - mu) ** 2).mean(-1, keepdims=True)
        return (h - mu) / jnp.sqrt(var + EPS) * g + be

    h = jax.nn.relu(ln(lin(x, W0, b0), g0, be0))
    h = jax.nn.relu(ln(lin(h, W1, b1), g1, be1))
    h = jnp.concatenate([h, x], axis=1)            # latent_in at layer 2
    h = jax.nn.relu(ln(lin(h, W2, b2), g2, be2))
    h = jax.nn.relu(ln(lin(h, W3, b3), g3, be3))
    h = jnp.tanh(lin(h, W4, b4))
    return h[:, 0:1], h[:, 1:2]


if __name__ == "__main__":
    key = jax.random.PRNGKey(0)
    kx, kp = jax.random.split(key)

    N = 512
    x = jax.random.normal(kx, (N, IN_DIM), jnp.float32)
    params = init_params(kp)

    sdf0, sdf1 = dsdf_decoder(x, params)
    jax.block_until_ready((sdf0, sdf1))

    r0, r1 = ref_forward(x, params)
    assert sdf0.shape == (N, 1) and sdf1.shape == (N, 1)
    assert jnp.allclose(sdf0, r0, atol=2e-3, rtol=2e-3), \
        float(jnp.max(jnp.abs(sdf0 - r0)))
    assert jnp.allclose(sdf1, r1, atol=2e-3, rtol=2e-3), \
        float(jnp.max(jnp.abs(sdf1 - r1)))

    print("KERNEL_OK")
</pallas_src>

<mosaic_0001>
module attributes {stable_mosaic.version = 11 : i64} {
  func.func @dsdf_kernel(%arg0: i32, %arg1: memref<32x256xbf16, #tpu.memory_space<vmem>>, %arg2: memref<64x32xbf16, #tpu.memory_space<vmem>>, %arg3: memref<64x3xf32, #tpu.memory_space<vmem>>, %arg4: memref<32x64xbf16, #tpu.memory_space<vmem>>, %arg5: memref<32x3xf32, #tpu.memory_space<vmem>>, %arg6: memref<64x32xbf16, #tpu.memory_space<vmem>>, %arg7: memref<64x32xbf16, #tpu.memory_space<vmem>>, %arg8: memref<64x3xf32, #tpu.memory_space<vmem>>, %arg9: memref<64x64xbf16, #tpu.memory_space<vmem>>, %arg10: memref<64x3xf32, #tpu.memory_space<vmem>>, %arg11: memref<2x64xbf16, #tpu.memory_space<vmem>>, %arg12: memref<2x1xf32, #tpu.memory_space<vmem>>, %arg13: memref<2x256xf32, #tpu.memory_space<vmem>>) attributes {dimension_semantics = [#tpu.dimension_semantics<parallel>], iteration_bounds = array<i64: 2>, scalar_prefetch = 0 : i64, scratch_operands = 0 : i64, tpu.core_type = #tpu.core_type<tc>, window_params = [{transform_indices = @transform_0, window_bounds = array<i64: 32, 256>}, {pipeline_mode = #tpu.pipeline_mode<synchronous>, transform_indices = @transform_1, window_bounds = array<i64: 64, 32>}, {pipeline_mode = #tpu.pipeline_mode<synchronous>, transform_indices = @transform_2, window_bounds = array<i64: 64, 3>}, {pipeline_mode = #tpu.pipeline_mode<synchronous>, transform_indices = @transform_3, window_bounds = array<i64: 32, 64>}, {pipeline_mode = #tpu.pipeline_mode<synchronous>, transform_indices = @transform_4, window_bounds = array<i64: 32, 3>}, {pipeline_mode = #tpu.pipeline_mode<synchronous>, transform_indices = @transform_5, window_bounds = array<i64: 64, 32>}, {pipeline_mode = #tpu.pipeline_mode<synchronous>, transform_indices = @transform_6, window_bounds = array<i64: 64, 32>}, {pipeline_mode = #tpu.pipeline_mode<synchronous>, transform_indices = @transform_7, window_bounds = array<i64: 64, 3>}, {pipeline_mode = #tpu.pipeline_mode<synchronous>, transform_indices = @transform_8, window_bounds = array<i64: 64, 64>}, {pipeline_mode = #tpu.pipeline_mode<synchronous>, transform_indices = @transform_9, window_bounds = array<i64: 64, 3>}, {pipeline_mode = #tpu.pipeline_mode<synchronous>, transform_indices = @transform_10, window_bounds = array<i64: 2, 64>}, {pipeline_mode = #tpu.pipeline_mode<synchronous>, transform_indices = @transform_11, window_bounds = array<i64: 2, 1>}, {transform_indices = @transform_12, window_bounds = array<i64: 2, 256>}]} {
    %c0 = arith.constant 0 : index
    %c0_0 = arith.constant 0 : index
    %0 = vector.load %arg1[%c0, %c0_0] : memref<32x256xbf16, #tpu.memory_space<vmem>>, vector<32x256xbf16>
    %c0_1 = arith.constant 0 : index
    %c0_2 = arith.constant 0 : index
    %1 = vector.load %arg2[%c0_1, %c0_2] : memref<64x32xbf16, #tpu.memory_space<vmem>>, vector<64x32xbf16>
    %cst = arith.constant dense<0.000000e+00> : vector<64x256xf32>
    %2 = tpu.matmul %1, %0, %cst {dimension_numbers = #tpu.dot_dimension_numbers<[1], [0], [0], [1], [0, 0, 1, 1], [], []>} : vector<64x32xbf16>, vector<32x256xbf16>, vector<64x256xf32> -> vector<64x256xf32>
    %c0_3 = arith.constant 0 : index
    %c0_4 = arith.constant 0 : index
    %3 = vector.load %arg3[%c0_3, %c0_4] : memref<64x3xf32, #tpu.memory_space<vmem>>, vector<64x1xf32>
    %c0_5 = arith.constant 0 : index
    %c1 = arith.constant 1 : index
    %4 = vector.load %arg3[%c0_5, %c1] : memref<64x3xf32, #tpu.memory_space<vmem>>, vector<64x1xf32>
    %c0_6 = arith.constant 0 : index
    %c2 = arith.constant 2 : index
    %5 = vector.load %arg3[%c0_6, %c2] : memref<64x3xf32, #tpu.memory_space<vmem>>, vector<64x1xf32>
    %6 = vector.broadcast %3 : vector<64x1xf32> to vector<64x256xf32>
    %7 = arith.addf %2, %6 : vector<64x256xf32>
    %cst_7 = arith.constant dense<0.000000e+00> : vector<256xf32>
    %8 = vector.multi_reduction <add>, %7, %cst_7 [0] : vector<64x256xf32> to vector<256xf32>
    %9 = vector.shape_cast %8 : vector<256xf32> to vector<1x256xf32>
    %cst_8 = arith.constant 1.562500e-02 : f32
    %10 = vector.broadcast %cst_8 : f32 to vector<1x256xf32>
    %11 = arith.mulf %9, %10 : vector<1x256xf32>
    %12 = arith.mulf %7, %7 : vector<64x256xf32>
    %cst_9 = arith.constant dense<0.000000e+00> : vector<256xf32>
    %13 = vector.multi_reduction <add>, %12, %cst_9 [0] : vector<64x256xf32> to vector<256xf32>
    %14 = vector.shape_cast %13 : vector<256xf32> to vector<1x256xf32>
    %cst_10 = arith.constant 1.562500e-02 : f32
    %15 = vector.broadcast %cst_10 : f32 to vector<1x256xf32>
    %16 = arith.mulf %14, %15 : vector<1x256xf32>
    %17 = arith.mulf %11, %11 : vector<1x256xf32>
    %18 = arith.subf %16, %17 : vector<1x256xf32>
    %cst_11 = arith.constant 0.000000e+00 : f32
    %19 = vector.broadcast %cst_11 : f32 to vector<1x256xf32>
    %20 = arith.maximumf %18, %19 : vector<1x256xf32>
    %cst_12 = arith.constant 9.99999974E-6 : f32
    %21 = vector.broadcast %cst_12 : f32 to vector<1x256xf32>
    %22 = arith.addf %20, %21 : vector<1x256xf32>
    %23 = math.rsqrt %22 : vector<1x256xf32>
    %24 = vector.broadcast %11 : vector<1x256xf32> to vector<64x256xf32>
    %25 = arith.subf %7, %24 : vector<64x256xf32>
    %26 = vector.broadcast %23 : vector<1x256xf32> to vector<64x256xf32>
    %27 = arith.mulf %25, %26 : vector<64x256xf32>
    %28 = vector.broadcast %4 : vector<64x1xf32> to vector<64x256xf32>
    %29 = arith.mulf %27, %28 : vector<64x256xf32>
    %30 = vector.broadcast %5 : vector<64x1xf32> to vector<64x256xf32>
    %31 = arith.addf %29, %30 : vector<64x256xf32>
    %cst_13 = arith.constant 0.000000e+00 : f32
    %32 = vector.broadcast %cst_13 : f32 to vector<64x256xf32>
    %33 = arith.maximumf %31, %32 : vector<64x256xf32>
    %c0_14 = arith.constant 0 : index
    %c0_15 = arith.constant 0 : index
    %34 = vector.load %arg4[%c0_14, %c0_15] : memref<32x64xbf16, #tpu.memory_space<vmem>>, vector<32x64xbf16>
    %35 = arith.truncf %33 : vector<64x256xf32> to vector<64x256xbf16>
    %cst_16 = arith.constant dense<0.000000e+00> : vector<32x256xf32>
    %36 = tpu.matmul %34, %35, %cst_16 {dimension_numbers = #tpu.dot_dimension_numbers<[1], [0], [0], [1], [0, 0, 1, 1], [], []>} : vector<32x64xbf16>, vector<64x256xbf16>, vector<32x256xf32> -> vector<32x256xf32>
    %c0_17 = arith.constant 0 : index
    %c0_18 = arith.constant 0 : index
    %37 = vector.load %arg5[%c0_17, %c0_18] : memref<32x3xf32, #tpu.memory_space<vmem>>, vector<32x1xf32>
    %c0_19 = arith.constant 0 : index
    %c1_20 = arith.constant 1 : index
    %38 = vector.load %arg5[%c0_19, %c1_20] : memref<32x3xf32, #tpu.memory_space<vmem>>, vector<32x1xf32>
    %c0_21 = arith.constant 0 : index
    %c2_22 = arith.constant 2 : index
    %39 = vector.load %arg5[%c0_21, %c2_22] : memref<32x3xf32, #tpu.memory_space<vmem>>, vector<32x1xf32>
    %40 = vector.broadcast %37 : vector<32x1xf32> to vector<32x256xf32>
    %41 = arith.addf %36, %40 : vector<32x256xf32>
    %cst_23 = arith.constant dense<0.000000e+00> : vector<256xf32>
    %42 = vector.multi_reduction <add>, %41, %cst_23 [0] : vector<32x256xf32> to vector<256xf32>
    %43 = vector.shape_cast %42 : vector<256xf32> to vector<1x256xf32>
    %cst_24 = arith.constant 3.125000e-02 : f32
    %44 = vector.broadcast %cst_24 : f32 to vector<1x256xf32>
    %45 = arith.mulf %43, %44 : vector<1x256xf32>
    %46 = arith.mulf %41, %41 : vector<32x256xf32>
    %cst_25 = arith.constant dense<0.000000e+00> : vector<256xf32>
    %47 = vector.multi_reduction <add>, %46, %cst_25 [0] : vector<32x256xf32> to vector<256xf32>
    %48 = vector.shape_cast %47 : vector<256xf32> to vector<1x256xf32>
    %cst_26 = arith.constant 3.125000e-02 : f32
    %49 = vector.broadcast %cst_26 : f32 to vector<1x256xf32>
    %50 = arith.mulf %48, %49 : vector<1x256xf32>
    %51 = arith.mulf %45, %45 : vector<1x256xf32>
    %52 = arith.subf %50, %51 : vector<1x256xf32>
    %cst_27 = arith.constant 0.000000e+00 : f32
    %53 = vector.broadcast %cst_27 : f32 to vector<1x256xf32>
    %54 = arith.maximumf %52, %53 : vector<1x256xf32>
    %cst_28 = arith.constant 9.99999974E-6 : f32
    %55 = vector.broadcast %cst_28 : f32 to vector<1x256xf32>
    %56 = arith.addf %54, %55 : vector<1x256xf32>
    %57 = math.rsqrt %56 : vector<1x256xf32>
    %58 = vector.broadcast %45 : vector<1x256xf32> to vector<32x256xf32>
    %59 = arith.subf %41, %58 : vector<32x256xf32>
    %60 = vector.broadcast %57 : vector<1x256xf32> to vector<32x256xf32>
    %61 = arith.mulf %59, %60 : vector<32x256xf32>
    %62 = vector.broadcast %38 : vector<32x1xf32> to vector<32x256xf32>
    %63 = arith.mulf %61, %62 : vector<32x256xf32>
    %64 = vector.broadcast %39 : vector<32x1xf32> to vector<32x256xf32>
    %65 = arith.addf %63, %64 : vector<32x256xf32>
    %cst_29 = arith.constant 0.000000e+00 : f32
    %66 = vector.broadcast %cst_29 : f32 to vector<32x256xf32>
    %67 = arith.maximumf %65, %66 : vector<32x256xf32>
    %c0_30 = arith.constant 0 : index
    %c0_31 = arith.constant 0 : index
    %68 = vector.load %arg6[%c0_30, %c0_31] : memref<64x32xbf16, #tpu.memory_space<vmem>>, vector<64x32xbf16>
    %69 = arith.truncf %67 : vector<32x256xf32> to vector<32x256xbf16>
    %cst_32 = arith.constant dense<0.000000e+00> : vector<64x256xf32>
    %70 = tpu.matmul %68, %69, %cst_32 {dimension_numbers = #tpu.dot_dimension_numbers<[1], [0], [0], [1], [0, 0, 1, 1], [], []>} : vector<64x32xbf16>, vector<32x256xbf16>, vector<64x256xf32> -> vector<64x256xf32>
    %c0_33 = arith.constant 0 : index
    %c0_34 = arith.constant 0 : index
    %71 = vector.load %arg7[%c0_33, %c0_34] : memref<64x32xbf16, #tpu.memory_space<vmem>>, vector<64x32xbf16>
    %cst_35 = arith.constant dense<0.000000e+00> : vector<64x256xf32>
    %72 = tpu.matmul %71, %0, %cst_35 {dimension_numbers = #tpu.dot_dimension_numbers<[1], [0], [0], [1], [0, 0, 1, 1], [], []>} : vector<64x32xbf16>, vector<32x256xbf16>, vector<64x256xf32> -> vector<64x256xf32>
    %73 = arith.addf %70, %72 : vector<64x256xf32>
    %c0_36 = arith.constant 0 : index
    %c0_37 = arith.constant 0 : index
    %74 = vector.load %arg8[%c0_36, %c0_37] : memref<64x3xf32, #tpu.memory_space<vmem>>, vector<64x1xf32>
    %c0_38 = arith.constant 0 : index
    %c1_39 = arith.constant 1 : index
    %75 = vector.load %arg8[%c0_38, %c1_39] : memref<64x3xf32, #tpu.memory_space<vmem>>, vector<64x1xf32>
    %c0_40 = arith.constant 0 : index
    %c2_41 = arith.constant 2 : index
    %76 = vector.load %arg8[%c0_40, %c2_41] : memref<64x3xf32, #tpu.memory_space<vmem>>, vector<64x1xf32>
    %77 = vector.broadcast %74 : vector<64x1xf32> to vector<64x256xf32>
    %78 = arith.addf %73, %77 : vector<64x256xf32>
    %cst_42 = arith.constant dense<0.000000e+00> : vector<256xf32>
    %79 = vector.multi_reduction <add>, %78, %cst_42 [0] : vector<64x256xf32> to vector<256xf32>
    %80 = vector.shape_cast %79 : vector<256xf32> to vector<1x256xf32>
    %cst_43 = arith.constant 1.562500e-02 : f32
    %81 = vector.broadcast %cst_43 : f32 to vector<1x256xf32>
    %82 = arith.mulf %80, %81 : vector<1x256xf32>
    %83 = arith.mulf %78, %78 : vector<64x256xf32>
    %cst_44 = arith.constant dense<0.000000e+00> : vector<256xf32>
    %84 = vector.multi_reduction <add>, %83, %cst_44 [0] : vector<64x256xf32> to vector<256xf32>
    %85 = vector.shape_cast %84 : vector<256xf32> to vector<1x256xf32>
    %cst_45 = arith.constant 1.562500e-02 : f32
    %86 = vector.broadcast %cst_45 : f32 to vector<1x256xf32>
    %87 = arith.mulf %85, %86 : vector<1x256xf32>
    %88 = arith.mulf %82, %82 : vector<1x256xf32>
    %89 = arith.subf %87, %88 : vector<1x256xf32>
    %cst_46 = arith.constant 0.000000e+00 : f32
    %90 = vector.broadcast %cst_46 : f32 to vector<1x256xf32>
    %91 = arith.maximumf %89, %90 : vector<1x256xf32>
    %cst_47 = arith.constant 9.99999974E-6 : f32
    %92 = vector.broadcast %cst_47 : f32 to vector<1x256xf32>
    %93 = arith.addf %91, %92 : vector<1x256xf32>
    %94 = math.rsqrt %93 : vector<1x256xf32>
    %95 = vector.broadcast %82 : vector<1x256xf32> to vector<64x256xf32>
    %96 = arith.subf %78, %95 : vector<64x256xf32>
    %97 = vector.broadcast %94 : vector<1x256xf32> to vector<64x256xf32>
    %98 = arith.mulf %96, %97 : vector<64x256xf32>
    %99 = vector.broadcast %75 : vector<64x1xf32> to vector<64x256xf32>
    %100 = arith.mulf %98, %99 : vector<64x256xf32>
    %101 = vector.broadcast %76 : vector<64x1xf32> to vector<64x256xf32>
    %102 = arith.addf %100, %101 : vector<64x256xf32>
    %cst_48 = arith.constant 0.000000e+00 : f32
    %103 = vector.broadcast %cst_48 : f32 to vector<64x256xf32>
    %104 = arith.maximumf %102, %103 : vector<64x256xf32>
    %c0_49 = arith.constant 0 : index
    %c0_50 = arith.constant 0 : index
    %105 = vector.load %arg9[%c0_49, %c0_50] : memref<64x64xbf16, #tpu.memory_space<vmem>>, vector<64x64xbf16>
    %106 = arith.truncf %104 : vector<64x256xf32> to vector<64x256xbf16>
    %cst_51 = arith.constant dense<0.000000e+00> : vector<64x256xf32>
    %107 = tpu.matmul %105, %106, %cst_51 {dimension_numbers = #tpu.dot_dimension_numbers<[1], [0], [0], [1], [0, 0, 1, 1], [], []>} : vector<64x64xbf16>, vector<64x256xbf16>, vector<64x256xf32> -> vector<64x256xf32>
    %c0_52 = arith.constant 0 : index
    %c0_53 = arith.constant 0 : index
    %108 = vector.load %arg10[%c0_52, %c0_53] : memref<64x3xf32, #tpu.memory_space<vmem>>, vector<64x1xf32>
    %c0_54 = arith.constant 0 : index
    %c1_55 = arith.constant 1 : index
    %109 = vector.load %arg10[%c0_54, %c1_55] : memref<64x3xf32, #tpu.memory_space<vmem>>, vector<64x1xf32>
    %c0_56 = arith.constant 0 : index
    %c2_57 = arith.constant 2 : index
    %110 = vector.load %arg10[%c0_56, %c2_57] : memref<64x3xf32, #tpu.memory_space<vmem>>, vector<64x1xf32>
    %111 = vector.broadcast %108 : vector<64x1xf32> to vector<64x256xf32>
    %112 = arith.addf %107, %111 : vector<64x256xf32>
    %cst_58 = arith.constant dense<0.000000e+00> : vector<256xf32>
    %113 = vector.multi_reduction <add>, %112, %cst_58 [0] : vector<64x256xf32> to vector<256xf32>
    %114 = vector.shape_cast %113 : vector<256xf32> to vector<1x256xf32>
    %cst_59 = arith.constant 1.562500e-02 : f32
    %115 = vector.broadcast %cst_59 : f32 to vector<1x256xf32>
    %116 = arith.mulf %114, %115 : vector<1x256xf32>
    %117 = arith.mulf %112, %112 : vector<64x256xf32>
    %cst_60 = arith.constant dense<0.000000e+00> : vector<256xf32>
    %118 = vector.multi_reduction <add>, %117, %cst_60 [0] : vector<64x256xf32> to vector<256xf32>
    %119 = vector.shape_cast %118 : vector<256xf32> to vector<1x256xf32>
    %cst_61 = arith.constant 1.562500e-02 : f32
    %120 = vector.broadcast %cst_61 : f32 to vector<1x256xf32>
    %121 = arith.mulf %119, %120 : vector<1x256xf32>
    %122 = arith.mulf %116, %116 : vector<1x256xf32>
    %123 = arith.subf %121, %122 : vector<1x256xf32>
    %cst_62 = arith.constant 0.000000e+00 : f32
    %124 = vector.broadcast %cst_62 : f32 to vector<1x256xf32>
    %125 = arith.maximumf %123, %124 : vector<1x256xf32>
    %cst_63 = arith.constant 9.99999974E-6 : f32
    %126 = vector.broadcast %cst_63 : f32 to vector<1x256xf32>
    %127 = arith.addf %125, %126 : vector<1x256xf32>
    %128 = math.rsqrt %127 : vector<1x256xf32>
    %129 = vector.broadcast %116 : vector<1x256xf32> to vector<64x256xf32>
    %130 = arith.subf %112, %129 : vector<64x256xf32>
    %131 = vector.broadcast %128 : vector<1x256xf32> to vector<64x256xf32>
    %132 = arith.mulf %130, %131 : vector<64x256xf32>
    %133 = vector.broadcast %109 : vector<64x1xf32> to vector<64x256xf32>
    %134 = arith.mulf %132, %133 : vector<64x256xf32>
    %135 = vector.broadcast %110 : vector<64x1xf32> to vector<64x256xf32>
    %136 = arith.addf %134, %135 : vector<64x256xf32>
    %cst_64 = arith.constant 0.000000e+00 : f32
    %137 = vector.broadcast %cst_64 : f32 to vector<64x256xf32>
    %138 = arith.maximumf %136, %137 : vector<64x256xf32>
    %c0_65 = arith.constant 0 : index
    %c0_66 = arith.constant 0 : index
    %139 = vector.load %arg11[%c0_65, %c0_66] : memref<2x64xbf16, #tpu.memory_space<vmem>>, vector<2x64xbf16>
    %140 = arith.truncf %138 : vector<64x256xf32> to vector<64x256xbf16>
    %cst_67 = arith.constant dense<0.000000e+00> : vector<2x256xf32>
    %141 = tpu.matmul %139, %140, %cst_67 {dimension_numbers = #tpu.dot_dimension_numbers<[1], [0], [0], [1], [0, 0, 1, 1], [], []>} : vector<2x64xbf16>, vector<64x256xbf16>, vector<2x256xf32> -> vector<2x256xf32>
    %c0_68 = arith.constant 0 : index
    %c0_69 = arith.constant 0 : index
    %142 = vector.load %arg12[%c0_68, %c0_69] : memref<2x1xf32, #tpu.memory_space<vmem>>, vector<2x1xf32>
    %143 = vector.broadcast %142 : vector<2x1xf32> to vector<2x256xf32>
    %144 = arith.addf %141, %143 : vector<2x256xf32>
    %145 = math.tanh %144 : vector<2x256xf32>
    %c0_70 = arith.constant 0 : index
    %c0_71 = arith.constant 0 : index
    %146 = vector.load %arg13[%c0_70, %c0_71] : memref<2x256xf32, #tpu.memory_space<vmem>>, vector<2x256xf32>
    tpu.vector_store %arg13[%c0_70, %c0_71], %145 {strides = array<i32>} : memref<2x256xf32, #tpu.memory_space<vmem>>, vector<2x256xf32>,
    return
  }
  func.func @transform_0(%arg0: i32) -> (i32, i32) {
    %c0_i32 = arith.constant 0 : i32
    %c0_i32_0 = arith.constant 0 : i32
    return %c0_i32, %arg0 : i32, i32
  }
  func.func @transform_1(%arg0: i32) -> (i32, i32) {
    %c0_i32 = arith.constant 0 : i32
    %c0_i32_0 = arith.constant 0 : i32
    %c0_i32_1 = arith.constant 0 : i32
    return %c0_i32, %c0_i32_0 : i32, i32
  }
  func.func @transform_2(%arg0: i32) -> (i32, i32) {
    %c0_i32 = arith.constant 0 : i32
    %c0_i32_0 = arith.constant 0 : i32
    %c0_i32_1 = arith.constant 0 : i32
    return %c0_i32, %c0_i32_0 : i32, i32
  }
  func.func @transform_3(%arg0: i32) -> (i32, i32) {
    %c0_i32 = arith.constant 0 : i32
    %c0_i32_0 = arith.constant 0 : i32
    %c0_i32_1 = arith.constant 0 : i32
    return %c0_i32, %c0_i32_0 : i32, i32
  }
  func.func @transform_4(%arg0: i32) -> (i32, i32) {
    %c0_i32 = arith.constant 0 : i32
    %c0_i32_0 = arith.constant 0 : i32
    %c0_i32_1 = arith.constant 0 : i32
    return %c0_i32, %c0_i32_0 : i32, i32
  }
  func.func @transform_5(%arg0: i32) -> (i32, i32) {
    %c0_i32 = arith.constant 0 : i32
    %c0_i32_0 = arith.constant 0 : i32
    %c0_i32_1 = arith.constant 0 : i32
    return %c0_i32, %c0_i32_0 : i32, i32
  }
  func.func @transform_6(%arg0: i32) -> (i32, i32) {
    %c0_i32 = arith.constant 0 : i32
    %c0_i32_0 = arith.constant 0 : i32
    %c0_i32_1 = arith.constant 0 : i32
    return %c0_i32, %c0_i32_0 : i32, i32
  }
  func.func @transform_7(%arg0: i32) -> (i32, i32) {
    %c0_i32 = arith.constant 0 : i32
    %c0_i32_0 = arith.constant 0 : i32
    %c0_i32_1 = arith.constant 0 : i32
    return %c0_i32, %c0_i32_0 : i32, i32
  }
  func.func @transform_8(%arg0: i32) -> (i32, i32) {
    %c0_i32 = arith.constant 0 : i32
    %c0_i32_0 = arith.constant 0 : i32
    %c0_i32_1 = arith.constant 0 : i32
    return %c0_i32, %c0_i32_0 : i32, i32
  }
  func.func @transform_9(%arg0: i32) -> (i32, i32) {
    %c0_i32 = arith.constant 0 : i32
    %c0_i32_0 = arith.constant 0 : i32
    %c0_i32_1 = arith.constant 0 : i32
    return %c0_i32, %c0_i32_0 : i32, i32
  }
  func.func @transform_10(%arg0: i32) -> (i32, i32) {
    %c0_i32 = arith.constant 0 : i32
    %c0_i32_0 = arith.constant 0 : i32
    %c0_i32_1 = arith.constant 0 : i32
    return %c0_i32, %c0_i32_0 : i32, i32
  }
  func.func @transform_11(%arg0: i32) -> (i32, i32) {
    %c0_i32 = arith.constant 0 : i32
    %c0_i32_0 = arith.constant 0 : i32
    %c0_i32_1 = arith.constant 0 : i32
    return %c0_i32, %c0_i32_0 : i32, i32
  }
  func.func @transform_12(%arg0: i32) -> (i32, i32) {
    %c0_i32 = arith.constant 0 : i32
    %c0_i32_0 = arith.constant 0 : i32
    return %c0_i32, %arg0 : i32, i32
  }
}

</mosaic_0001>

<bundles_post_ra>
// kernel: tpu_custom_call.1
= control target key start
LH: loop header
LB: loop body
LE: loop exit
PB: predicated region body
PF: predicated region fallthrough
CT: control target
= control target key end

     0   :  { %s3384_s0 = inlined_call_operand.vmem [shape: bf16[32,512], index: 0, kind: input, shape index: {}]   ;;  %s3385_s1 = inlined_call_operand.vmem [shape: bf16[64,32], index: 1, kind: input, shape index: {}]   ;;  %s3386_s2 = inlined_call_operand.vmem [shape: f32[64,3], index: 2, kind: input, shape index: {}]   ;;  %s3387_s3 = inlined_call_operand.vmem [shape: bf16[32,64], index: 3, kind: input, shape index: {}]   ;;  %s3388_s4 = inlined_call_operand.vmem [shape: f32[32,3], index: 4, kind: input, shape index: {}]   ;;  %s3389_s5 = inlined_call_operand.vmem [shape: bf16[64,32], index: 5, kind: input, shape index: {}]   ;;  %s3390_s6 = inlined_call_operand.vmem [shape: bf16[64,32], index: 6, kind: input, shape index: {}]   ;;  %s3391_s7 = inlined_call_operand.vmem [shape: f32[64,3], index: 7, kind: input, shape index: {}]   ;;  %s3392_s8 = inlined_call_operand.vmem [shape: bf16[64,64], index: 8, kind: input, shape index: {}]   ;;  %s3393_s9 = inlined_call_operand.vmem [shape: f32[64,3], index: 9, kind: input, shape index: {}]   ;;  %s3394_s10 = inlined_call_operand.vmem [shape: bf16[2,64], index: 10, kind: input, shape index: {}]   ;;  %s3395_s11 = inlined_call_operand.vmem [shape: f32[2,1], index: 11, kind: input, shape index: {}]   ;;  %s3396_s12 = inlined_call_operand.hbm [shape: f32[2,512], index: 12, kind: output, shape index: {}]  }
   0x1   :  { %3399 = sst [smem:[#allocation6_spill]] %s3384_s0 }
   0x2   :  { %3400 = sst [smem:[#allocation7_spill]] %s3385_s1 }
   0x3   :  { %3401 = sst [smem:[#allocation8_spill]] %s3386_s2 }
   0x4   :  { %17 = vsyncpa [#allocation4], 0 }
   0x5   :  { %19 = vsyncpa [#allocation4 + $0x1], 0  ;;  %s2509_s21 = smov 0   ;;  %s2511_s22 = smov 0  }
   0x6   :  { %s2513_s23 = smov 0   ;;  %s2515_s24 = smov 0  }
   0x7 LB: > { %s3397_s25 = sadd.s32 4294967295, %s2438_s24   ;;  %s2179_s26 = sadd.s32 4294967294, %s2438_s24   ;;  %s2438_s24 = sphi %s2515_s24, %s3412_s24   ;;  %s2434_s23 = sphi %s2513_s23, %s3411_s23   ;;  %s2430_s22 = sphi %s2511_s22, %s3410_s22   ;;  %s2426_s21 = sphi %s2509_s21, %s3409_s21  }
   0x8   : > { %s2532_s27 = sadd.s32 1, %s2438_s24   ;;  %s32_s28 = sadd.s32 1, %s2434_s23 }
   0x9   : > { %s29_s29 = ssub.s32 %s2438_s24, %s2532_s27  ;;  %p39_p0 = scmp.ne.s32.totalorder %s2434_s23, %s2430_s22 }
   0xa   : > { %p30_p1 = scmp.eq.s32.totalorder %s29_s29, 0  ;;  %p40_p2 = scmp.eq.s32.totalorder %s2438_s24, 0 }
   0xb   : > { %p300_p3 = scmp.eq.s32.totalorder %s3397_s25, 1  ;;  %p305_p4 = scmp.ne.s32.totalorder %s2430_s22, %s2426_s21 }
   0xc   : > { %s2545_s30 = scalar_select %p30_p1, %s2434_s23, %s32_s28  }
   0xd   : > { %p41_p5 = por %p40_p2, %p39_p0  ;;  %p2547_p6 = por %p300_p3, %p39_p0 }
   0xe   : > { %p306_p7 = scmp.eq.s32.totalorder %s2179_s26, 1  ;;  %p3398_p9 = scmp.ge.s32.totalorder %s2438_s24, 2 }
  0x10   : > { %p2551_p8 = por %p306_p7, %p305_p4  ;;  %355 = sbr.rel (%p3398_p9) target bundleno = 33 (0x21), region = 60 }
  0x15   : > { %358 = sbr.rel (!%p41_p5) target bundleno = 33 (0x21), region = 64  ;;  %s360_s15 = sand.u32 (%p41_p5), 1, %s2434_s23  }
  0x16   : > { %s2235_s16 = sshll.u32 (%p41_p5), %s2438_s24, 3  ;;  %s2182_s17 = sshll.u32 (%p41_p5), %s360_s15, 5 }
  0x17   : > { %s3404_s0 = sld [smem:[#allocation6_spill]] (%p41_p5)  ;;  %s362_s26 = scalar_lea.vmem (%p41_p5), [#allocation2], %s2182_s17 }
  0x1d   : > { %s365_s20 = scalar_lea.vmem %s3404_s0, %s2235_s16 }
  0x1e   : > { %v400_v0 = vld [vmem:[%s365_s20] sm:$0xff]  ;;  %v402_v1 = vld [vmem:[%s365_s20 + $0x10] sm:$0xff] }
  0x1f   : > { %v404_v2 = vld [vmem:[%s365_s20 + $0x20] sm:$0xff]  ;;  %401 = vst [vmem:[%s362_s26] sm:$0xff] %v400_v0  ;;  %403 = vst [vmem:[%s362_s26 + $0x8] sm:$0xff] %v402_v1  ;;  %v406_v3 = vld [vmem:[%s365_s20 + $0x30] sm:$0xff] }
  0x20   : > { %405 = vst [vmem:[%s362_s26 + $0x10] sm:$0xff] %v404_v2  ;;  %407 = vst [vmem:[%s362_s26 + $0x18] sm:$0xff] %v406_v3 }
  0x21 PF: > { %p2185_p10 = scmp.ge.s32.totalorder %s2438_s24, 1  ;;  %p412_p11 = scmp.lt.s32.totalorder %s2438_s24, 3 }
  0x23   : > { %p413_p12 = pnand %p2185_p10, %p412_p11 }
  0x24   : > { %s2566_s28 = sand.u32 (!%p413_p12), 1, %s2430_s22   ;;  %s3405_s2 = sld [smem:[#allocation8_spill]] (!%p413_p12) }
  0x25   : > { %416 = sbr.rel (%p413_p12) target bundleno = 1416 (0x588), region = 102  ;;  %s2186_s29 = sshll.u32 (!%p413_p12), %s2566_s28, 5 }
  0x26   : > { %s421_s15 = scalar_lea.vmem (!%p413_p12), [#allocation2], %s2186_s29  ;;  %s3406_s1 = sld [smem:[#allocation7_spill]] (!%p413_p12) }
  0x27   : > { %s2187_s0 = sshll.u32 (!%p413_p12), %s2566_s28, 2  ;;  %s3407_s25 = sadd.s32 (!%p413_p12), 4294967295, %s2438_s24  }
  0x28   : > { %s2236_s29 = sshll.u32 (!%p413_p12), %s3407_s25, 6  ;;  %s2100_s20 = scalar_lea.sflag (!%p413_p12), [#allocation4], %s2566_s28 }
  0x29   : > { %s2112_s19 = scalar_lea.hbm (!%p413_p12), %s3396_s12, %s2236_s29 }
  0x2a   : > { %v2440_v4 = vmov 0   ;;  %v2573_v5 = vld [vmem:[%s421_s15 + $0x14] ss:$8 sps:$4 sm:$0xff]   ;;  %v2575_v6 = vld [vmem:[%s421_s15 + $0x10] ss:$8 sps:$4 sm:$0xff]   ;;  %v475_v9 = vld [vmem:[%s3405_s2] sm:$0xff] }
  0x2b   : > { %608 = vmatprep.mubr.bf16.mxu0 %v2440_v4  ;;  %2287 = vset.pattern.permute.xlu0 %v2440_v4  ;;  %v2578_v7 = vld [vmem:[%s421_s15 + $0x4] ss:$8 sps:$4 sm:$0xff]   ;;  %v2581_v8 = vld [vmem:[%s421_s15] ss:$8 sps:$4 sm:$0xff]   ;;  %v477_v10 = vld [vmem:[%s3405_s2 + $0x10] sm:$0xff]  ;;  %vm563_vm0 = vcmask 261120  }
  0x2c   : > { %2288 = vset.pattern.permute.xlu1 %v2440_v4  ;;  %970 = vmatprep.mubr.bf16.mxu1 %v2440_v4  ;;  %v2340_v11 = vld [vmem:[%s3406_s1] sm:$0xff]   ;;  %v476_v12 = vld [vmem:[%s3405_s2 + $0x8] sm:$0xff]  ;;  %v478_v13 = vld [vmem:[%s3405_s2 + $0x18] sm:$0xff]  ;;  %v2441_v19 = vmov 1   ;;  %v2442_v21 = vmov 2   ;;  %vm921_vm1 = vcmask 523264  }
  0x2d   : > { %588 = vmatprep.subr.bf16.mxu0 %v2573_v5  ;;  %485 = vperm.xlu0 %2287, %v475_v9   ;;  %v479_v14 = vld [vmem:[%s3405_s2 + $0x20] sm:$0xff]  ;;  %v480_v15 = vld [vmem:[%s3405_s2 + $0x28] sm:$0xff]  ;;  %v481_v17 = vld [vmem:[%s3405_s2 + $0x30] sm:$0xff]  ;;  %s459_s15 = scalar_lea.vmem [#allocation3], %s2187_s0 }
  0x2e   : > { %589 = vmatpush1.bf16.msra.mxu0 %v2575_v6  ;;  %495 = vperm.xlu1 %2288, %v477_v10   ;;  %v2341_v16 = vld [vmem:[%s3406_s1 + $0x8] sm:$0xff]   ;;  %v482_v18 = vld [vmem:[%s3405_s2 + $0x38] sm:$0xff]  ;;  %v2342_v20 = vld [vmem:[%s3406_s1 + $0x10] sm:$0xff]   ;;  %s2114_s16 = sshll.u32 %s459_s15, 4  ;;  %s2115_s16 = int_to_ptr.vmem [resolvable:$true] %s2114_s16 }
  0x2f   : > { %590 = vmatprep.subr.bf16.mxu0 %v2578_v7  ;;  %v2343_v22 = vld [vmem:[%s3406_s1 + $0x18] sm:$0xff]   ;;  %v888_v23 = vld [vmem:[%s3388_s4 + $0x8] sm:$0xff]  ;;  %v887_v24 = vld [vmem:[%s3388_s4] sm:$0xff]  ;;  %s2378_s26 = scalar_lea.vmem %s2115_s16, 64  ;;  %s2443_s1 = smov [#allocation3]  }
  0x30   : > { %v889_v25 = vld [vmem:[%s3388_s4 + $0x10] sm:$0xff]  ;;  %v890_v26 = vld [vmem:[%s3388_s4 + $0x18] sm:$0xff]  ;;  %p2379_p13 = scmp.ne.s32.totalorder %s2115_s16, %s2378_s26  ;;  %s2382_s2 = sshll.u32 %s2443_s1, 4  ;;  %s2383_s2 = int_to_ptr.vmem [resolvable:$false] %s2382_s2 }
  0x31   : > { %490 = vperm.xlu0 %2287, %v476_v12   ;;  %s2384_s0 = scalar_lea.vmem %s2383_s2, 128  ;;  %p2385_p2 = scmp.lt.s32.totalorder %s2115_s16, %s2383_s2 }
  0x32   : > { %591 = vmatpush1.bf16.msra.mxu0 %v2581_v8  ;;  %500 = vperm.xlu1 %2288, %v478_v13   ;;  %p2380_p0 = pnand %p2379_p13, %p2547_p6  ;;  %p2386_p3 = scmp.lt.s32.totalorder %s2384_s0, %s2378_s26 }
  0x34   : > { %p2381_p1 = pneg %p2380_p0  ;;  %p2387_p4 = por %p2386_p3, %p2385_p2 }
  0x35   : > { %2196 = vmatmul.mubr.msk.bf16.vlgmr.msra.gmra.mxu0 %vm563_vm0, %v2340_v11  ;;  %505 = vperm.xlu0 %2287, %v479_v14  }
  0x36   : > { %618 = vmatprep.mubr.bf16.mxu0 %v2440_v4  ;;  %510 = vperm.xlu1 %2288, %v480_v15   ;;  %p2388_p5 = pnand %p2387_p4, %p2381_p1 }
  0x39   : > { %515 = vperm.xlu0 %2287, %v481_v17  }
  0x3a   : > { %520 = vperm.xlu1 %2288, %v482_v18  }
  0x3d   : > { %2197 = vmatmul.mubr.msk.bf16.gmra.mxu0 %vm563_vm0, %v2341_v16  ;;  %2289 = vset.pattern.permute.xlu0 %v2441_v19 }
  0x3e   : > { %628 = vmatprep.mubr.bf16.mxu0 %v2440_v4  ;;  %2290 = vset.pattern.permute.xlu1 %v2441_v19 }
  0x3f   : > { %792 = vperm.xlu1 %2290, %v482_v18   ;;  %788 = vperm.xlu0 %2289, %v481_v17  }
  0x43   : > { %2291 = vset.pattern.permute.xlu1 %v2442_v21  ;;  %772 = vperm.xlu0 %2289, %v477_v10  }
  0x44   : > { %836 = vperm.xlu1 %2291, %v481_v17  }
  0x45   : > { %2198 = vmatmul.mubr.msk.bf16.gmra.mxu0 %vm563_vm0, %v2342_v20 }
  0x46   : > { %638 = vmatprep.mubr.bf16.mxu0 %v2440_v4 }
  0x47   : > { %2294 = vset.pattern.permute.xlu0 %v2442_v21 }
  0x48   : > { %2292 = vset.pattern.permute.xlu1 %v2441_v19  ;;  %840 = vperm.xlu0 %2294, %v482_v18  }
  0x49   : > { %780 = vperm.xlu1 %2292, %v479_v14  }
  0x4c   : > { %828 = vperm.xlu0 %2294, %v479_v14  }
  0x4d   : > { %2199 = vmatmul.mubr.msk.bf16.gmra.mxu0 %vm563_vm0, %v2343_v22  ;;  %784 = vperm.xlu1 %2292, %v480_v15  }
  0x4e   : > { %960 = vmatprep.mubr.bf16.mxu0 %v2440_v4 }
  0x50   : > { %824 = vperm.xlu0 %2294, %v478_v13  }
  0x51   : > { %2293 = vset.pattern.permute.xlu1 %v2442_v21 }
  0x52   : > { %832 = vperm.xlu1 %2293, %v480_v15  }
  0x54   : > { %812 = vperm.xlu0 %2294, %v475_v9  }
  0x56   : > { %2295 = vset.pattern.permute.xlu1 %v2441_v19 }
  0x57   : > { %776 = vperm.xlu1 %2295, %v478_v13  }
  0x58   : > { %2299 = vset.pattern.permute.xlu0 %v2440_v4 }
  0x59   : > { %893 = vperm.xlu0 %2299, %v887_v24  }
  0x5b   : > { %2296 = vset.pattern.permute.xlu1 %v2442_v21 }
  0x5c   : > { %820 = vperm.xlu1 %2296, %v477_v10  }
  0x5d   : > { %908 = vperm.xlu0 %2299, %v890_v26  }
  0x60   : > { %2297 = vset.pattern.permute.xlu1 %v2441_v19 }
  0x61   : > { %764 = vperm.xlu1 %2297, %v475_v9   ;;  %2302 = vset.pattern.permute.xlu0 %v2441_v19 }
  0x62   : > { %1068 = vperm.xlu0 %2302, %v890_v26  }
  0x65   : > { %768 = vperm.xlu1 %2297, %v476_v12  }
  0x66   : > { %1056 = vperm.xlu0 %2302, %v887_v24  }
  0x69   : > { %2298 = vset.pattern.permute.xlu1 %v2442_v21 }
  0x6a   : > { %816 = vperm.xlu1 %2298, %v476_v12   ;;  %2305 = vset.pattern.permute.xlu0 %v2442_v21 }
  0x6b   : > { %1080 = vperm.xlu0 %2305, %v887_v24  }
  0x6e   : > { %2300 = vset.pattern.permute.xlu1 %v2440_v4 }
  0x6f   : > { %898 = vperm.xlu1 %2300, %v888_v23   ;;  %2308 = vset.pattern.permute.xlu0 %v2440_v4 }
  0x73   : > { %903 = vperm.xlu1 %2300, %v889_v25  }
  0x77   : > { %2301 = vset.pattern.permute.xlu1 %v2441_v19 }
  0x78   : > { %1064 = vperm.xlu1 %2301, %v889_v25  }
  0x7c   : > { %2303 = vset.pattern.permute.xlu1 %v2442_v21 }
  0x7d   : > { %1088 = vperm.xlu1 %2303, %v889_v25  }
  0x81   : > { %1092 = vperm.xlu1 %2303, %v890_v26  }
  0x85   : > { %2304 = vset.pattern.permute.xlu1 %v2441_v19 }
  0x86   : > { %1060 = vperm.xlu1 %2304, %v888_v23  }
  0x8a   : > { %2306 = vset.pattern.permute.xlu1 %v2442_v21 }
  0x8b   : > { %1084 = vperm.xlu1 %2306, %v888_v23  }
  0x8f   : > { %2307 = vset.pattern.permute.xlu1 %v2440_v4 }
  0xa8   : > { %v486_v29 = vpop.permute.xlu0 %485 }
  0xa9   : > { %v496_v32 = vpop.permute.xlu1 %495 }
  0xac   : > { %v491_v34 = vpop.permute.xlu0 %490 }
  0xad   : > { %v501_v41 = vpop.permute.xlu1 %500 }
  0xb0   : > { %v506_v49 = vpop.permute.xlu0 %505 }
  0xb1   : > { %v511_v60 = vpop.permute.xlu1 %510 }
  0xb4   : > { %v516_v17 = vpop.permute.xlu0 %515 }
  0xf5   : > { %v610_v27 = vpop.f32.mrf.mxu0 }
  0xf6   : > { %v2663_v38 = vadd.f32 %v610_v27, %v486_v29 }
  0xf7   : > { %v612_v28 = vpop.f32.mrf.mxu0 }
  0xf8   : > { %v2669_v43 = vadd.f32 %v612_v28, %v486_v29  ;;  %v677_v48 = vmul.f32 %v2663_v38, %v2663_v38 }
  0xf9   : > { %v614_v30 = vpop.f32.mrf.mxu0 }
  0xfa   : > { %v2661_v36 = vadd.f32 %v614_v30, %v491_v34  ;;  %v678_v55 = vmul.f32 %v2669_v43, %v2669_v43  ;;  %v521_v30 = vpop.permute.xlu1 %520 }
  0xfb   : > { %v616_v31 = vpop.f32.mrf.mxu0 }
  0xfc   : > { %v2665_v39 = vadd.f32 %v616_v31, %v491_v34  ;;  %v679_v44 = vmul.f32 %v2661_v36, %v2661_v36  ;;  %v649_v56 = vadd.f32 %v2661_v36, %v2663_v38 }
  0xfd   : > { %v620_v33 = vpop.f32.mrf.mxu0 }
  0xfe   : > { %v2667_v40 = vadd.f32 %v620_v33, %v496_v32  ;;  %v680_v50 = vmul.f32 %v2665_v39, %v2665_v39  ;;  %v693_v57 = vadd.f32 %v679_v44, %v677_v48  ;;  %v662_v63 = vadd.f32 %v2665_v39, %v2669_v43 }
  0xff   : > { %v622_v35 = vpop.f32.mrf.mxu0 }
 0x100   : > { %v2673_v45 = vadd.f32 %v622_v35, %v496_v32  ;;  %v681_v51 = vmul.f32 %v2667_v40, %v2667_v40  ;;  %v650_v0 = vadd.f32 %v649_v56, %v2667_v40  ;;  %v706_v2 = vadd.f32 %v680_v50, %v678_v55 }
 0x101   : > { %v624_v37 = vpop.f32.mrf.mxu0 }
 0x102   : > { %v2675_v46 = vadd.f32 %v624_v37, %v501_v41  ;;  %v682_v58 = vmul.f32 %v2673_v45, %v2673_v45  ;;  %v694_v3 = vadd.f32 %v693_v57, %v681_v51  ;;  %v663_v12 = vadd.f32 %v662_v63, %v2673_v45 }
 0x103   : > { %v626_v42 = vpop.f32.mrf.mxu0 }
 0x104   : > { %v2683_v52 = vadd.f32 %v626_v42, %v501_v41  ;;  %v683_v59 = vmul.f32 %v2675_v46, %v2675_v46  ;;  %v651_v13 = vadd.f32 %v650_v0, %v2675_v46  ;;  %v707_v15 = vadd.f32 %v706_v2, %v682_v58  ;;  %v2738_v58 = vpop.permute.xlu1 %792 }
 0x105   : > { %v630_v47 = vpop.f32.mrf.mxu0 }
 0x106   : > { %v2685_v53 = vadd.f32 %v630_v47, %v506_v49  ;;  %v684_v9 = vmul.f32 %v2683_v52, %v2683_v52  ;;  %v695_v16 = vadd.f32 %v694_v3, %v683_v59  ;;  %v664_v23 = vadd.f32 %v663_v12, %v2683_v52 }
 0x107   : > { %v632_v54 = vpop.f32.mrf.mxu0 }
 0x108   : > { %v2695_v61 = vadd.f32 %v632_v54, %v506_v49  ;;  %v685_v10 = vmul.f32 %v2685_v53, %v2685_v53  ;;  %v652_v24 = vadd.f32 %v651_v13, %v2685_v53  ;;  %v708_v26 = vadd.f32 %v707_v15, %v684_v9 }
 0x109   : > { %v634_v62 = vpop.f32.mrf.mxu0 }
 0x10a   : > { %v2700_v1 = vadd.f32 %v634_v62, %v511_v60  ;;  %v686_v18 = vmul.f32 %v2695_v61, %v2695_v61  ;;  %v696_v27 = vadd.f32 %v695_v16, %v685_v10  ;;  %v665_v31 = vadd.f32 %v664_v23, %v2695_v61  ;;  %v2743_v16 = vpop.permute.xlu1 %836 }
 0x10b   : > { %v636_v11 = vpop.f32.mrf.mxu0 }
 0x10c   : > { %v2708_v14 = vadd.f32 %v636_v11, %v511_v60  ;;  %v687_v20 = vmul.f32 %v2700_v1, %v2700_v1  ;;  %v653_v32 = vadd.f32 %v652_v24, %v2700_v1  ;;  %v709_v35 = vadd.f32 %v708_v26, %v686_v18 }
 0x10d   : > { %v640_v22 = vpop.f32.mrf.mxu0 }
 0x10e   : > { %v2716_v25 = vadd.f32 %v640_v22, %v516_v17  ;;  %v688_v28 = vmul.f32 %v2708_v14, %v2708_v14  ;;  %v697_v37 = vadd.f32 %v696_v27, %v687_v20  ;;  %v666_v42 = vadd.f32 %v665_v31, %v2708_v14 }
 0x10f   : > { %v642_v29 = vpop.f32.mrf.mxu0 }
 0x110   : > { %v689_v33 = vmul.f32 %v2716_v25, %v2716_v25  ;;  %v2724_v34 = vadd.f32 %v642_v29, %v516_v17  ;;  %v654_v44 = vadd.f32 %v653_v32, %v2716_v25  ;;  %v710_v49 = vadd.f32 %v709_v35, %v688_v28  ;;  %v2745_v32 = vpop.permute.xlu1 %780 }
 0x111   : > { %v644_v41 = vpop.f32.mrf.mxu0 }
 0x112   : > { %v690_v47 = vmul.f32 %v2724_v34, %v2724_v34  ;;  %v2730_v48 = vadd.f32 %v644_v41, %v521_v30  ;;  %v698_v50 = vadd.f32 %v697_v37, %v689_v33  ;;  %v667_v54 = vadd.f32 %v666_v42, %v2724_v34 }
 0x113   : > { %v646_v51 = vpop.f32.mrf.mxu0 }
 0x114   : > { %v655_v55 = vadd.f32 %v654_v44, %v2730_v48  ;;  %v691_v56 = vmul.f32 %v2730_v48, %v2730_v48  ;;  %v2736_v57 = vadd.f32 %v646_v51, %v521_v30  ;;  %v711_v59 = vadd.f32 %v710_v49, %v690_v47 }
 0x116   : > { %v656_v60 = vrot.slane %v655_v55, 4  ;;  %v699_v62 = vadd.f32 %v698_v50, %v691_v56  ;;  %v668_v63 = vadd.f32 %v667_v54, %v2736_v57  ;;  %v692_v0 = vmul.f32 %v2736_v57, %v2736_v57  ;;  %v785_v54 = vpop.permute.xlu1 %784 }
 0x118   : > { %v657_v2 = vadd.f32 %v656_v60, %v655_v55  ;;  %v700_v3 = vrot.slane %v699_v62, 4  ;;  %v669_v9 = vrot.slane %v668_v63, 4  ;;  %v712_v10 = vadd.f32 %v711_v59, %v692_v0  ;;  %v789_v0 = vpop.permute.xlu0 %788 }
 0x11a   : > { %v658_v11 = vrot.slane %v657_v2, 2  ;;  %v701_v12 = vadd.f32 %v700_v3, %v699_v62  ;;  %v670_v13 = vadd.f32 %v669_v9, %v668_v63  ;;  %v713_v15 = vrot.slane %v712_v10, 4  ;;  %v833_v63 = vpop.permute.xlu1 %832 }
 0x11c   : > { %v659_v17 = vadd.f32 %v658_v11, %v657_v2  ;;  %v702_v18 = vrot.slane %v701_v12, 2  ;;  %v671_v20 = vrot.slane %v670_v13, 2  ;;  %v714_v22 = vadd.f32 %v713_v15, %v712_v10  ;;  %v773_v9 = vpop.permute.xlu0 %772 }
 0x11e   : > { %v660_v23 = vrot.slane %v659_v17, 1  ;;  %v703_v24 = vadd.f32 %v702_v18, %v701_v12  ;;  %v672_v26 = vadd.f32 %v671_v20, %v670_v13  ;;  %v715_v27 = vrot.slane %v714_v22, 2  ;;  %v2755_v3 = vpop.permute.xlu1 %776 }
 0x120   : > { %v661_v28 = vadd.f32 %v660_v23, %v659_v17  ;;  %v704_v29 = vrot.slane %v703_v24, 1  ;;  %v673_v30 = vrot.slane %v672_v26, 1  ;;  %v716_v31 = vadd.f32 %v715_v27, %v714_v22  ;;  %v841_v13 = vpop.permute.xlu0 %840 }
 0x122   : > { %v2747_v33 = vmul.f32 0.015625, %v661_v28  ;;  %v705_v35 = vadd.f32 %v704_v29, %v703_v24  ;;  %v674_v37 = vadd.f32 %v673_v30, %v672_v26  ;;  %v717_v41 = vrot.slane %v716_v31, 1  ;;  %v2761_v12 = vpop.permute.xlu1 %820 }
 0x124   : > { %v719_v42 = vmul.f32 0.015625, %v705_v35  ;;  %v721_v44 = vmul.f32 %v2747_v33, %v2747_v33  ;;  %v2751_v47 = vmul.f32 0.015625, %v674_v37  ;;  %v718_v49 = vadd.f32 %v717_v41, %v716_v31  ;;  %v829_v37 = vpop.permute.xlu0 %828 }
 0x125   : > { %v745_v10 = vsub.f32 %v2730_v48, %v2747_v33  ;;  %v743_v11 = vsub.f32 %v2716_v25, %v2747_v33  ;;  %v739_v18 = vsub.f32 %v2685_v53, %v2747_v33  ;;  %v741_v22 = vsub.f32 %v2700_v1, %v2747_v33 }
 0x126   : > { %v723_v50 = vsub.f32 %v719_v42, %v721_v44  ;;  %v722_v51 = vmul.f32 %v2751_v47, %v2751_v47  ;;  %v720_v55 = vmul.f32 0.015625, %v718_v49  ;;  %v746_v17 = vsub.f32 %v2736_v57, %v2751_v47 }
 0x127   : > { %v740_v20 = vsub.f32 %v2695_v61, %v2751_v47  ;;  %v742_v25 = vsub.f32 %v2708_v14, %v2751_v47  ;;  %v744_v23 = vsub.f32 %v2724_v34, %v2751_v47  ;;  %v737_v57 = vsub.f32 %v2675_v46, %v2747_v33 }
 0x128   : > { %v725_v56 = vmax.f32 %v723_v50, 0.0  ;;  %v724_v59 = vsub.f32 %v720_v55, %v722_v51  ;;  %v738_v53 = vsub.f32 %v2683_v52, %v2751_v47  ;;  %v735_v61 = vsub.f32 %v2667_v40, %v2747_v33  ;;  %v765_v52 = vpop.permute.xlu1 %764 }
 0x129   : > { %v736_v1 = vsub.f32 %v2673_v45, %v2751_v47  ;;  %v731_v34 = vsub.f32 %v2663_v38, %v2747_v33  ;;  %v732_v40 = vsub.f32 %v2669_v43, %v2751_v47  ;;  %v733_v45 = vsub.f32 %v2661_v36, %v2747_v33 }
 0x12a   : > { %v727_v60 = vadd.f32 1e-05, %v725_v56  ;;  %v726_v62 = vmax.f32 %v724_v59, 0.0  ;;  %v734_v41 = vsub.f32 %v2665_v39, %v2751_v47 }
 0x12c   : > { %2358 = vrsqrt.f32 %v727_v60  ;;  %v728_v2 = vadd.f32 1e-05, %v726_v62 }
 0x12e   : > { %2360 = vrsqrt.f32 %v728_v2 }
 0x139   : > { %v2359_v15 = vpop.eup %2358 }
 0x13a   : > { %v761_v48 = vmul.f32 %v2359_v15, %v745_v10  ;;  %v759_v24 = vmul.f32 %v2359_v15, %v743_v11  ;;  %v757_v14 = vmul.f32 %v2359_v15, %v741_v22  ;;  %v755_v35 = vmul.f32 %v2359_v15, %v739_v18  ;;  %v825_v22 = vpop.permute.xlu0 %824 }
 0x13b   : > { %v2361_v26 = vpop.eup %2360  ;;  %v751_v55 = vmul.f32 %v2359_v15, %v735_v61  ;;  %v753_v60 = vmul.f32 %v2359_v15, %v737_v57 }
 0x13c   : > { %v809_v27 = vmul.f32 %v2738_v58, %v761_v48  ;;  %v807_v28 = vmul.f32 %v789_v0, %v759_v24  ;;  %v762_v29 = vmul.f32 %v2361_v26, %v746_v17  ;;  %v756_v30 = vmul.f32 %v2361_v26, %v740_v20  ;;  %v769_v20 = vpop.permute.xlu1 %768 }
 0x13d   : > { %v758_v46 = vmul.f32 %v2361_v26, %v742_v25  ;;  %v760_v31 = vmul.f32 %v2361_v26, %v744_v23  ;;  %v754_v49 = vmul.f32 %v2361_v26, %v738_v53  ;;  %v805_v50 = vmul.f32 %v785_v54, %v757_v14 }
 0x13e   : > { %v810_v42 = vmul.f32 %v2738_v58, %v762_v29  ;;  %v855_v51 = vadd.f32 %v2743_v16, %v807_v28  ;;  %v752_v56 = vmul.f32 %v2361_v26, %v736_v1  ;;  %v804_v59 = vmul.f32 %v2745_v32, %v756_v30 }
 0x13f   : > { %v806_v44 = vmul.f32 %v785_v54, %v758_v46  ;;  %v808_v38 = vmul.f32 %v789_v0, %v760_v31  ;;  %v857_v62 = vadd.f32 %v841_v13, %v809_v27  ;;  %v803_v36 = vmul.f32 %v2745_v32, %v755_v35  ;;  %v813_v31 = vpop.permute.xlu0 %812 }
 0x140   : > { %v800_v39 = vmul.f32 %v773_v9, %v752_v56  ;;  %v858_v47 = vadd.f32 %v841_v13, %v810_v42  ;;  %v802_v58 = vmul.f32 %v2755_v3, %v754_v49  ;;  %v747_v0 = vmul.f32 %v2359_v15, %v731_v34  ;;  %v817_v46 = vpop.permute.xlu1 %816 }
 0x141   : > { %v856_v43 = vadd.f32 %v2743_v16, %v808_v38  ;;  %v854_v33 = vadd.f32 %v833_v63, %v806_v44  ;;  %v748_v2 = vmul.f32 %v2361_v26, %v732_v40  ;;  %v749_v54 = vmul.f32 %v2359_v15, %v733_v45 }
 0x142   : > { %v853_v10 = vadd.f32 %v833_v63, %v805_v50  ;;  %v871_v11 = vmax.f32 %v855_v51, 0.0  ;;  %v799_v18 = vmul.f32 %v773_v9, %v751_v55  ;;  %v873_v48 = vmax.f32 %v857_v62, 0.0  ;;  %v2346_v62 = vld [vmem:[%s3390_s6] sm:$0xff]  }
 0x143   : > { %v872_v17 = vmax.f32 %v856_v43, 0.0  ;;  %v874_v16 = vmax.f32 %v858_v47, 0.0  ;;  %v852_v25 = vadd.f32 %v829_v37, %v804_v59  ;;  %v750_v23 = vmul.f32 %v2361_v26, %v734_v41  ;;  %v2344_v43 = vld [vmem:[%s3387_s3] sm:$0xff]   ;;  %v2859_v47 = vld [vmem:[%s3391_s7 + $0x18] sm:$0xff] }
 0x144   : > { %v870_v24 = vmax.f32 %v854_v33, 0.0  ;;  %v801_v32 = vmul.f32 %v2755_v3, %v753_v60  ;;  %v848_v13 = vadd.f32 %v2761_v12, %v800_v39  ;;  %v851_v57 = vadd.f32 %v829_v37, %v803_v36  ;;  %v2345_v60 = vld [vmem:[%s3387_s3 + $0x8] sm:$0xff]   ;;  %v2850_v33 = vld [vmem:[%s3391_s7 + $0x10] sm:$0xff]  ;;  %v1345_v39 = vld [vmem:[%s3391_s7 + $0x20] sm:$0xff] }
 0x145   : > { %v796_v53 = vmul.f32 %v765_v52, %v748_v2  ;;  %v868_v61 = vmax.f32 %v852_v25, 0.0  ;;  %v798_v1 = vmul.f32 %v769_v20, %v750_v23  ;;  %v850_v15 = vadd.f32 %v825_v22, %v802_v58  ;;  %v2843_v36 = vld [vmem:[%s3391_s7 + $0x8] sm:$0xff]  ;;  %v1347_v58 = vld [vmem:[%s3391_s7 + $0x30] sm:$0xff]  ;;  %v1348_v2 = vld [vmem:[%s3391_s7 + $0x38] sm:$0xff] }
 0x146   : > { %v869_v63 = vmax.f32 %v853_v10, 0.0  ;;  %v847_v27 = vadd.f32 %v2761_v12, %v799_v18  ;;  %v885_v9 = vpack.c.bf16 %v873_v48, %v871_v11  ;;  %v795_v14 = vmul.f32 %v765_v52, %v747_v0  ;;  %1356 = vperm.xlu0 %2308, %v2843_v36   ;;  %v1346_v0 = vld [vmem:[%s3391_s7 + $0x28] sm:$0xff]  ;;  %v894_v10 = vpop.permute.xlu0 %893 }
 0x147   : > { %v886_v28 = vpack.c.bf16 %v874_v16, %v872_v17  ;;  %v864_v34 = vmax.f32 %v848_v13, 0.0  ;;  %v867_v29 = vmax.f32 %v851_v57, 0.0  ;;  %v797_v30 = vmul.f32 %v769_v20, %v749_v54  ;;  %v899_v54 = vpop.permute.xlu1 %898 }
 0x148   : > { %v849_v26 = vadd.f32 %v825_v22, %v801_v32  ;;  %v866_v3 = vmax.f32 %v850_v15, 0.0  ;;  %v846_v35 = vadd.f32 %v817_v46, %v798_v1  ;;  %v844_v40 = vadd.f32 %v813_v31, %v796_v53 }
 0x149   : > { %936 = vmatprep.subr.bf16.mxu0 %v886_v28  ;;  %2237 = vmatprep.subr.bf16.mxu1 %v886_v28  ;;  %v884_v37 = vpack.c.bf16 %v870_v24, %v868_v61  ;;  %v863_v45 = vmax.f32 %v847_v27, 0.0  ;;  %v883_v12 = vpack.c.bf16 %v869_v63, %v867_v29  ;;  %v845_v41 = vadd.f32 %v817_v46, %v797_v30 }
 0x14a   : > { %937 = vmatpush1.bf16.msra.mxu0 %v885_v9  ;;  %2241 = vmatpush1.bf16.msra.mxu1 %v885_v9  ;;  %v865_v52 = vmax.f32 %v849_v26, 0.0  ;;  %v843_v42 = vadd.f32 %v813_v31, %v795_v14  ;;  %v862_v44 = vmax.f32 %v846_v35, 0.0  ;;  %v860_v38 = vmax.f32 %v844_v40, 0.0  ;;  %v909_v16 = vpop.permute.xlu0 %908 }
 0x14b   : > { %938 = vmatprep.subr.bf16.mxu0 %v884_v37  ;;  %2238 = vmatprep.subr.bf16.mxu1 %v884_v37  ;;  %v882_v49 = vpack.c.bf16 %v866_v3, %v864_v34  ;;  %v861_v51 = vmax.f32 %v845_v41, 0.0  ;;  %v904_v18 = vpop.permute.xlu1 %903 }
 0x14c   : > { %v881_v50 = vpack.c.bf16 %v865_v52, %v863_v45  ;;  %v859_v55 = vmax.f32 %v843_v42, 0.0  ;;  %v880_v56 = vpack.c.bf16 %v862_v44, %v860_v38  ;;  %1371 = vperm.xlu0 %2308, %v1345_v39  }
 0x14e   : > { %939 = vmatpush1.bf16.msra.mxu0 %v883_v12  ;;  %2242 = vmatpush1.bf16.msra.mxu1 %v883_v12  ;;  %v879_v59 = vpack.c.bf16 %v861_v51, %v859_v55 }
 0x14f   : > { %940 = vmatprep.subr.bf16.mxu0 %v882_v49  ;;  %2239 = vmatprep.subr.bf16.mxu1 %v882_v49 }
 0x150   : > { %1381 = vperm.xlu0 %2308, %v1347_v58  }
 0x152   : > { %941 = vmatpush1.bf16.msra.mxu0 %v881_v50  ;;  %2243 = vmatpush1.bf16.msra.mxu1 %v881_v50 }
 0x153   : > { %942 = vmatprep.subr.bf16.mxu0 %v880_v56  ;;  %2240 = vmatprep.subr.bf16.mxu1 %v880_v56 }
 0x154   : > { %2309 = vset.pattern.permute.xlu0 %v2441_v19 }
 0x155   : > { %1544 = vperm.xlu0 %2309, %v1347_v58  }
 0x156   : > { %943 = vmatpush1.bf16.msra.mxu0 %v879_v59  ;;  %2244 = vmatpush1.bf16.msra.mxu1 %v879_v59 }
 0x157   : > { %1175 = vmatprep.subr.bf16.mxu1 %v2573_v5  ;;  %v2348_v5 = vld [vmem:[%s3390_s6 + $0x8] sm:$0xff]  }
 0x159   : > { %2202 = vmatmul.mubr.msk.bf16.vlgmr.msra.gmra.mxu0 %vm921_vm1, %v2344_v43  ;;  %2203 = vmatmul.mubr.msk.bf16.vlgmr.msra.gmra.mxu1 %vm921_vm1, %v2345_v60 }
 0x15a   : > { %1176 = vmatpush1.bf16.msra.mxu1 %v2575_v6  ;;  %1195 = vmatprep.mubr.bf16.mxu1 %v2440_v4  ;;  %v2350_v6 = vld [vmem:[%s3390_s6 + $0x10] sm:$0xff]  }
 0x15b   : > { %1177 = vmatprep.subr.bf16.mxu1 %v2578_v7  ;;  %1300 = vmatprep.mubr.bf16.mxu0 %v2440_v4  ;;  %v2352_v7 = vld [vmem:[%s3390_s6 + $0x18] sm:$0xff]  }
 0x15c   : > { %1528 = vperm.xlu0 %2309, %v2850_v33  }
 0x15e   : > { %1178 = vmatpush1.bf16.msra.mxu1 %v2581_v8  ;;  %v2838_v8 = vld [vmem:[%s3391_s7] sm:$0xff] }
 0x15f   : > { %1351 = vperm.xlu1 %2307, %v2838_v8  }
 0x160   : > { %2314 = vset.pattern.permute.xlu0 %v2442_v21 }
 0x161   : > { %2208 = vmatmul.mubr.msk.bf16.vlgmr.msra.gmra.mxu1 %vm563_vm0, %v2346_v62  ;;  %1596 = vperm.xlu0 %2314, %v1348_v2  }
 0x162   : > { %1205 = vmatprep.mubr.bf16.mxu1 %v2440_v4 }
 0x163   : > { %1361 = vperm.xlu1 %2307, %v2850_v33  }
 0x165   : > { %1584 = vperm.xlu0 %2314, %v1345_v39  }
 0x167   : > { %1366 = vperm.xlu1 %2307, %v2859_v47  }
 0x169   : > { %2209 = vmatmul.mubr.msk.bf16.gmra.mxu1 %vm563_vm0, %v2348_v5  ;;  %1580 = vperm.xlu0 %2314, %v2859_v47  }
 0x16a   : > { %1215 = vmatprep.mubr.bf16.mxu1 %v2440_v4 }
 0x16b   : > { %1376 = vperm.xlu1 %2307, %v1346_v0  }
 0x16d   : > { %1568 = vperm.xlu0 %2314, %v2838_v8  }
 0x16f   : > { %1386 = vperm.xlu1 %2307, %v1348_v2  }
 0x171   : > { %2210 = vmatmul.mubr.msk.bf16.gmra.mxu1 %vm563_vm0, %v2350_v6  ;;  %2319 = vset.pattern.permute.xlu0 %v2440_v4 }
 0x172   : > { %1225 = vmatprep.mubr.bf16.mxu1 %v2440_v4 }
 0x173   : > { %2310 = vset.pattern.permute.xlu1 %v2441_v19 }
 0x174   : > { %1548 = vperm.xlu1 %2310, %v1348_v2  }
 0x178   : > { %2311 = vset.pattern.permute.xlu1 %v2442_v21 }
 0x179   : > { %2211 = vmatmul.mubr.msk.bf16.gmra.mxu1 %vm563_vm0, %v2352_v7  ;;  %1592 = vperm.xlu1 %2311, %v1347_v58  }
 0x17a   : > { %1759 = vmatprep.mubr.bf16.mxu1 %v2440_v4 }
 0x17d   : > { %2312 = vset.pattern.permute.xlu1 %v2441_v19 }
 0x17e   : > { %1536 = vperm.xlu1 %2312, %v1345_v39  }
 0x182   : > { %1540 = vperm.xlu1 %2312, %v1346_v0  }
 0x186   : > { %2313 = vset.pattern.permute.xlu1 %v2442_v21 }
 0x187   : > { %1588 = vperm.xlu1 %2313, %v1346_v0  }
 0x18b   : > { %2315 = vset.pattern.permute.xlu1 %v2441_v19 }
 0x18c   : > { %1532 = vperm.xlu1 %2315, %v2859_v47  }
 0x190   : > { %2316 = vset.pattern.permute.xlu1 %v2442_v21 }
 0x191   : > { %1576 = vperm.xlu1 %2316, %v2850_v33  }
 0x195   : > { %2317 = vset.pattern.permute.xlu1 %v2441_v19 }
 0x196   : > { %1520 = vperm.xlu1 %2317, %v2838_v8  }
 0x19a   : > { %1524 = vperm.xlu1 %2317, %v2843_v36  }
 0x19e   : > { %2318 = vset.pattern.permute.xlu1 %v2442_v21 }
 0x19f   : > { %1572 = vperm.xlu1 %2318, %v2843_v36  }
 0x1a3   : > { %2320 = vset.pattern.permute.xlu1 %v2440_v4 }
 0x219   : > { %v962_v11 = vpop.f32.mrf.mxu0  ;;  %v972_v17 = vpop.f32.mrf.mxu1 }
 0x21a   : > { %v2879_v48 = vadd.f32 %v962_v11, %v894_v10  ;;  %v2883_v23 = vadd.f32 %v972_v17, %v904_v18 }
 0x21b   : > { %v964_v20 = vpop.f32.mrf.mxu0  ;;  %v974_v22 = vpop.f32.mrf.mxu1 }
 0x21c   : > { %v2881_v25 = vadd.f32 %v964_v20, %v894_v10  ;;  %v2888_v57 = vadd.f32 %v974_v22, %v904_v18  ;;  %v1001_v15 = vmul.f32 %v2879_v48, %v2879_v48  ;;  %v1005_v28 = vmul.f32 %v2883_v23, %v2883_v23 }
 0x21d   : > { %v966_v24 = vpop.f32.mrf.mxu0  ;;  %v976_v32 = vpop.f32.mrf.mxu1 }
 0x21e   : > { %v2885_v13 = vadd.f32 %v966_v24, %v899_v54  ;;  %v2890_v53 = vadd.f32 %v976_v32, %v909_v16  ;;  %v1002_v14 = vmul.f32 %v2881_v25, %v2881_v25  ;;  %v1006_v31 = vmul.f32 %v2888_v57, %v2888_v57 }
 0x21f   : > { %v968_v61 = vpop.f32.mrf.mxu0  ;;  %v978_v1 = vpop.f32.mrf.mxu1 }
 0x220   : > { %v981_v63 = vadd.f32 %v2885_v13, %v2879_v48  ;;  %v1003_v27 = vmul.f32 %v2885_v13, %v2885_v13  ;;  %v2899_v9 = vadd.f32 %v968_v61, %v899_v54  ;;  %v2905_v34 = vadd.f32 %v978_v1, %v909_v16 }
 0x221   : > { %v1007_v3 = vmul.f32 %v2890_v53, %v2890_v53 }
 0x222   : > { %v1009_v29 = vadd.f32 %v1003_v27, %v1001_v15  ;;  %v982_v30 = vadd.f32 %v981_v63, %v2883_v23  ;;  %v990_v26 = vadd.f32 %v2899_v9, %v2881_v25  ;;  %v1004_v46 = vmul.f32 %v2899_v9, %v2899_v9  ;;  %v1065_v15 = vpop.permute.xlu1 %1064 }
 0x223   : > { %v1008_v12 = vmul.f32 %v2905_v34, %v2905_v34 }
 0x224   : > { %v983_v35 = vadd.f32 %v982_v30, %v2890_v53  ;;  %v1010_v40 = vadd.f32 %v1009_v29, %v1005_v28  ;;  %v1018_v37 = vadd.f32 %v1004_v46, %v1002_v14  ;;  %v991_v45 = vadd.f32 %v990_v26, %v2888_v57  ;;  %v1069_v26 = vpop.permute.xlu0 %1068 }
 0x226   : > { %v984_v52 = vrot.slane %v983_v35, 4  ;;  %v1011_v41 = vadd.f32 %v1010_v40, %v1007_v3  ;;  %v992_v42 = vadd.f32 %v991_v45, %v2905_v34  ;;  %v1019_v44 = vadd.f32 %v1018_v37, %v1006_v31  ;;  %v1089_v29 = vpop.permute.xlu1 %1088 }
 0x228   : > { %v985_v38 = vadd.f32 %v984_v52, %v983_v35  ;;  %v1012_v49 = vrot.slane %v1011_v41, 4  ;;  %v993_v50 = vrot.slane %v992_v42, 4  ;;  %v1020_v51 = vadd.f32 %v1019_v44, %v1008_v12  ;;  %v1057_v37 = vpop.permute.xlu0 %1056 }
 0x22a   : > { %v986_v55 = vrot.slane %v985_v38, 2  ;;  %v1013_v56 = vadd.f32 %v1012_v49, %v1011_v41  ;;  %v994_v59 = vadd.f32 %v993_v50, %v992_v42  ;;  %v1021_v43 = vrot.slane %v1020_v51, 4  ;;  %v1093_v30 = vpop.permute.xlu1 %1092 }
 0x22c   : > { %v987_v60 = vadd.f32 %v986_v55, %v985_v38  ;;  %v1014_v62 = vrot.slane %v1013_v56, 2  ;;  %v995_v5 = vrot.slane %v994_v59, 2  ;;  %v1022_v6 = vadd.f32 %v1021_v43, %v1020_v51 }
 0x22e   : > { %v988_v7 = vrot.slane %v987_v60, 1  ;;  %v1015_v39 = vadd.f32 %v1014_v62, %v1013_v56  ;;  %v996_v47 = vadd.f32 %v995_v5, %v994_v59  ;;  %v1023_v58 = vrot.slane %v1022_v6, 2  ;;  %v1061_v40 = vpop.permute.xlu1 %1060 }
 0x230   : > { %v989_v0 = vadd.f32 %v988_v7, %v987_v60  ;;  %v1016_v2 = vrot.slane %v1015_v39, 1  ;;  %v997_v54 = vrot.slane %v996_v47, 1  ;;  %v1024_v10 = vadd.f32 %v1023_v58, %v1022_v6  ;;  %v1081_v7 = vpop.permute.xlu0 %1080 }
 0x232   : > { %v999_v11 = vmul.f32 0.03125, %v989_v0  ;;  %v1017_v17 = vadd.f32 %v1016_v2, %v1015_v39  ;;  %v998_v18 = vadd.f32 %v997_v54, %v996_v47  ;;  %v1025_v33 = vrot.slane %v1024_v10, 1 }
 0x234   : > { %v1027_v20 = vmul.f32 0.03125, %v1017_v17  ;;  %v1029_v22 = vmul.f32 %v999_v11, %v999_v11  ;;  %v1000_v16 = vmul.f32 0.03125, %v998_v18  ;;  %v1026_v24 = vadd.f32 %v1025_v33, %v1024_v10 }
 0x235   : > { %v1045_v46 = vsub.f32 %v2890_v53, %v999_v11  ;;  %v1043_v31 = vsub.f32 %v2883_v23, %v999_v11  ;;  %v1041_v3 = vsub.f32 %v2885_v13, %v999_v11  ;;  %v1039_v35 = vsub.f32 %v2879_v48, %v999_v11 }
 0x236   : > { %v1031_v32 = vsub.f32 %v1027_v20, %v1029_v22  ;;  %v1030_v61 = vmul.f32 %v1000_v16, %v1000_v16  ;;  %v1028_v1 = vmul.f32 0.03125, %v1026_v24  ;;  %v1046_v42 = vsub.f32 %v2905_v34, %v1000_v16 }
 0x237   : > { %v1044_v44 = vsub.f32 %v2888_v57, %v1000_v16  ;;  %v1042_v38 = vsub.f32 %v2899_v9, %v1000_v16  ;;  %v1040_v53 = vsub.f32 %v2881_v25, %v1000_v16  ;;  %v1085_v57 = vpop.permute.xlu1 %1084 }
 0x238   : > { %v1033_v8 = vmax.f32 %v1031_v32, 0.0  ;;  %v1032_v63 = vsub.f32 %v1028_v1, %v1030_v61  ;;  %v2347_v61 = vld [vmem:[%s3389_s5] sm:$0xff]   ;;  %v2349_v1 = vld [vmem:[%s3389_s5 + $0x8] sm:$0xff]  }
 0x23a   : > { %v1035_v27 = vadd.f32 1e-05, %v1033_v8  ;;  %v1034_v14 = vmax.f32 %v1032_v63, 0.0  ;;  %v2353_v8 = vld [vmem:[%s3389_s5 + $0x18] sm:$0xff]   ;;  %v1197_v63 = vpop.f32.mrf.mxu1 }
 0x23c   : > { %2362 = vrsqrt.f32 %v1035_v27  ;;  %v1036_v28 = vadd.f32 1e-05, %v1034_v14  ;;  %v1199_v27 = vpop.f32.mrf.mxu1 }
 0x23e   : > { %2364 = vrsqrt.f32 %v1036_v28  ;;  %v1201_v14 = vpop.f32.mrf.mxu1 }
 0x240   : > { %v1203_v28 = vpop.f32.mrf.mxu1 }
 0x249   : > { %v2363_v36 = vpop.eup %2362 }
 0x24a   : > { %v1051_v45 = vmul.f32 %v2363_v36, %v1043_v31  ;;  %v1053_v12 = vmul.f32 %v2363_v36, %v1045_v46  ;;  %v1049_v52 = vmul.f32 %v2363_v36, %v1041_v3  ;;  %v1047_v41 = vmul.f32 %v2363_v36, %v1039_v35  ;;  %v2962_v3 = vld [vmem:[%s3393_s9] sm:$0xff]  ;;  %v2967_v35 = vld [vmem:[%s3393_s9 + $0x8] sm:$0xff] }
 0x24b   : > { %v2365_v23 = vpop.eup %2364  ;;  %1657 = vperm.xlu0 %2319, %v2962_v3   ;;  %1662 = vperm.xlu1 %2320, %v2967_v35  }
 0x24c   : > { %v1075_v49 = vmul.f32 %v1065_v15, %v1051_v45  ;;  %v1077_v13 = vmul.f32 %v1069_v26, %v1053_v12  ;;  %v1052_v50 = vmul.f32 %v2365_v23, %v1044_v44  ;;  %v1054_v48 = vmul.f32 %v2365_v23, %v1046_v42  ;;  %v2979_v45 = vld [vmem:[%s3393_s9 + $0x18] sm:$0xff]  ;;  %v1352_v12 = vpop.permute.xlu1 %1351  ;;  %v2986_v44 = vld [vmem:[%s3393_s9 + $0x20] sm:$0xff] }
 0x24d   : > { %v1050_v51 = vmul.f32 %v2365_v23, %v1042_v38  ;;  %v1048_v55 = vmul.f32 %v2365_v23, %v1040_v53  ;;  %v1073_v43 = vmul.f32 %v1061_v40, %v1049_v52  ;;  %v1071_v60 = vmul.f32 %v1057_v37, %v1047_v41  ;;  %v2991_v38 = vld [vmem:[%s3393_s9 + $0x28] sm:$0xff] }
 0x24e   : > { %v1099_v56 = vadd.f32 %v1089_v29, %v1075_v49  ;;  %v1101_v59 = vadd.f32 %v1093_v30, %v1077_v13  ;;  %v1076_v62 = vmul.f32 %v1065_v15, %v1052_v50  ;;  %v1078_v5 = vmul.f32 %v1069_v26, %v1054_v48  ;;  %v2351_v15 = vld [vmem:[%s3389_s5 + $0x10] sm:$0xff]   ;;  %v1357_v13 = vpop.permute.xlu0 %1356 }
 0x24f   : > { %v1074_v34 = vmul.f32 %v1061_v40, %v1050_v51  ;;  %v1072_v6 = vmul.f32 %v1057_v37, %v1048_v55  ;;  %v1097_v2 = vadd.f32 %v1085_v57, %v1073_v43  ;;  %v1095_v54 = vadd.f32 %v1081_v7, %v1071_v60  ;;  %v2974_v37 = vld [vmem:[%s3393_s9 + $0x10] sm:$0xff]  ;;  %1672 = vperm.xlu0 %2319, %v2979_v45  }
 0x250   : > { %v1100_v9 = vadd.f32 %v1089_v29, %v1076_v62  ;;  %v1102_v39 = vadd.f32 %v1093_v30, %v1078_v5  ;;  %v1107_v58 = vmax.f32 %v1099_v56, 0.0  ;;  %v1109_v0 = vmax.f32 %v1101_v59, 0.0  ;;  %v1207_v29 = vpop.f32.mrf.mxu1  ;;  %1667 = vperm.xlu1 %2320, %v2974_v37   ;;  %v1362_v23 = vpop.permute.xlu1 %1361  ;;  %v1653_v51 = vld [vmem:[%s3393_s9 + $0x30] sm:$0xff]  ;;  %v3001_v59 = vld [vmem:[%s3393_s9 + $0x38] sm:$0xff] }
 0x251   : > { %v1098_v25 = vadd.f32 %v1085_v57, %v1074_v34  ;;  %v1096_v47 = vadd.f32 %v1081_v7, %v1072_v6  ;;  %v1105_v22 = vmax.f32 %v1097_v2, 0.0  ;;  %v1103_v16 = vmax.f32 %v1095_v54, 0.0 }
 0x252   : > { %v1108_v10 = vmax.f32 %v1100_v9, 0.0  ;;  %v1110_v11 = vmax.f32 %v1102_v39, 0.0  ;;  %v1121_v20 = vpack.c.bf16 %v1109_v0, %v1107_v58  ;;  %v1209_v30 = vpop.f32.mrf.mxu1 }
 0x253   : > { %v1106_v17 = vmax.f32 %v1098_v25, 0.0  ;;  %v1104_v18 = vmax.f32 %v1096_v47, 0.0  ;;  %v1119_v32 = vpack.c.bf16 %v1105_v22, %v1103_v16  ;;  %1682 = vperm.xlu0 %2319, %v2991_v38   ;;  %v1372_v16 = vpop.permute.xlu0 %1371 }
 0x254   : > { %v1122_v33 = vpack.c.bf16 %v1110_v11, %v1108_v10  ;;  %v1211_v26 = vpop.f32.mrf.mxu1  ;;  %1677 = vperm.xlu1 %2320, %v2986_v44   ;;  %v1367_v25 = vpop.permute.xlu1 %1366 }
 0x255   : > { %v1120_v24 = vpack.c.bf16 %v1106_v17, %v1104_v18 }
 0x256   : > { %1280 = vmatprep.subr.bf16.mxu0 %v1122_v33  ;;  %v1213_v46 = vpop.f32.mrf.mxu1 }
 0x257   : > { %1281 = vmatpush1.bf16.msra.mxu0 %v1121_v20  ;;  %1692 = vperm.xlu0 %2319, %v3001_v59  }
 0x258   : > { %1282 = vmatprep.subr.bf16.mxu0 %v1120_v24  ;;  %v1217_v40 = vpop.f32.mrf.mxu1  ;;  %1687 = vperm.xlu1 %2320, %v1653_v51  }
 0x25a   : > { %v1219_v42 = vpop.f32.mrf.mxu1 }
 0x25b   : > { %1283 = vmatpush1.bf16.msra.mxu0 %v1119_v32  ;;  %2324 = vset.pattern.permute.xlu0 %v2442_v21 }
 0x25c   : > { %v1221_v48 = vpop.f32.mrf.mxu1  ;;  %2321 = vset.pattern.permute.xlu1 %v2441_v19  ;;  %1979 = vperm.xlu0 %2324, %v2986_v44  }
 0x25d   : > { %1939 = vperm.xlu1 %2321, %v1653_v51  }
 0x25e   : > { %2216 = vmatmul.mubr.msk.bf16.vlgmr.msra.gmra.mxu0 %vm563_vm0, %v2347_v61  ;;  %v1223_v7 = vpop.f32.mrf.mxu1 }
 0x25f   : > { %1310 = vmatprep.mubr.bf16.mxu0 %v2440_v4 }
 0x260   : > { %v1227_v18 = vpop.f32.mrf.mxu1  ;;  %2325 = vset.pattern.permute.xlu0 %v2441_v19 }
 0x261   : > { %2322 = vset.pattern.permute.xlu1 %v2442_v21  ;;  %1943 = vperm.xlu0 %2325, %v3001_v59  }
 0x262   : > { %1987 = vperm.xlu1 %2322, %v1653_v51  }
 0x265   : > { %1931 = vperm.xlu0 %2325, %v2986_v44  }
 0x266   : > { %2217 = vmatmul.mubr.msk.bf16.gmra.mxu0 %vm563_vm0, %v2349_v1  ;;  %1991 = vperm.xlu1 %2322, %v3001_v59  }
 0x267   : > { %1320 = vmatprep.mubr.bf16.mxu0 %v2440_v4 }
 0x269   : > { %1927 = vperm.xlu0 %2325, %v2979_v45  }
 0x26a   : > { %2323 = vset.pattern.permute.xlu1 %v2441_v19 }
 0x26b   : > { %1935 = vperm.xlu1 %2323, %v2991_v38  }
 0x26d   : > { %1915 = vperm.xlu0 %2325, %v2962_v3  }
 0x26e   : > { %2218 = vmatmul.mubr.msk.bf16.gmra.mxu0 %vm563_vm0, %v2351_v15 }
 0x26f   : > { %1330 = vmatprep.mubr.bf16.mxu0 %v2440_v4  ;;  %2326 = vset.pattern.permute.xlu1 %v2442_v21 }
 0x270   : > { %1983 = vperm.xlu1 %2326, %v2991_v38  }
 0x271   : > { %2330 = vset.pattern.permute.xlu0 %v2442_v21 }
 0x272   : > { %1963 = vperm.xlu0 %2330, %v2962_v3  }
 0x274   : > { %2327 = vset.pattern.permute.xlu1 %v2441_v19 }
 0x275   : > { %1923 = vperm.xlu1 %2327, %v2974_v37  }
 0x276   : > { %2219 = vmatmul.mubr.msk.bf16.gmra.mxu0 %vm563_vm0, %v2353_v8  ;;  %2333 = vset.pattern.permute.xlu0 %v2440_v4 }
 0x277   : > { %2076 = vmatprep.mubr.bf16.mxu0 %v2440_v4 }
 0x279   : > { %2328 = vset.pattern.permute.xlu1 %v2442_v21 }
 0x27a   : > { %1971 = vperm.xlu1 %2328, %v2974_v37  }
 0x27e   : > { %1975 = vperm.xlu1 %2328, %v2979_v45  }
 0x282   : > { %2329 = vset.pattern.permute.xlu1 %v2441_v19 }
 0x283   : > { %1919 = vperm.xlu1 %2329, %v2967_v35  }
 0x287   : > { %2331 = vset.pattern.permute.xlu1 %v2442_v21 }
 0x288   : > { %1967 = vperm.xlu1 %2331, %v2967_v35  }
 0x28c   : > { %2332 = vset.pattern.permute.xlu1 %v2440_v4 }
 0x31e   : > { %v1302_v31 = vpop.f32.mrf.mxu0 }
 0x31f   : > { %v1303_v55 = vadd.f32 %v1302_v31, %v1197_v63  ;;  %v1229_v31 = vpop.f32.mrf.mxu1 }
 0x320   : > { %v1304_v36 = vpop.f32.mrf.mxu0 }
 0x321   : > { %v1305_v62 = vadd.f32 %v1304_v36, %v1199_v27  ;;  %v3006_v9 = vadd.f32 %v1352_v12, %v1303_v55 }
 0x322   : > { %v1306_v52 = vpop.f32.mrf.mxu0 }
 0x323   : > { %v1307_v49 = vadd.f32 %v1306_v52, %v1201_v14  ;;  %v3012_v2 = vadd.f32 %v1352_v12, %v1305_v62  ;;  %v1433_v20 = vmul.f32 %v3006_v9, %v3006_v9  ;;  %v1377_v14 = vpop.permute.xlu1 %1376 }
 0x324   : > { %v1308_v41 = vpop.f32.mrf.mxu0 }
 0x325   : > { %v1309_v56 = vadd.f32 %v1308_v41, %v1203_v28  ;;  %v3003_v5 = vadd.f32 %v1357_v13, %v1307_v49  ;;  %v1434_v8 = vmul.f32 %v3012_v2, %v3012_v2 }
 0x326   : > { %v1312_v53 = vpop.f32.mrf.mxu0 }
 0x327   : > { %v1313_v43 = vadd.f32 %v1312_v53, %v1207_v29  ;;  %v3008_v39 = vadd.f32 %v1357_v13, %v1309_v56  ;;  %v1435_v54 = vmul.f32 %v3003_v5, %v3003_v5  ;;  %v1405_v63 = vadd.f32 %v3003_v5, %v3006_v9 }
 0x328   : > { %v1314_v50 = vpop.f32.mrf.mxu0 }
 0x329   : > { %v1315_v34 = vadd.f32 %v1314_v50, %v1209_v30  ;;  %v3010_v47 = vadd.f32 %v1362_v23, %v1313_v43  ;;  %v1436_v22 = vmul.f32 %v3008_v39, %v3008_v39  ;;  %v1449_v27 = vadd.f32 %v1435_v54, %v1433_v20 }
 0x32a   : > { %v1316_v60 = vpop.f32.mrf.mxu0  ;;  %v1418_v29 = vadd.f32 %v3008_v39, %v3012_v2 }
 0x32b   : > { %v1317_v6 = vadd.f32 %v1316_v60, %v1211_v26  ;;  %v3017_v11 = vadd.f32 %v1362_v23, %v1315_v34  ;;  %v1437_v24 = vmul.f32 %v3010_v47, %v3010_v47  ;;  %v1462_v41 = vadd.f32 %v1436_v22, %v1434_v8  ;;  %v1231_v34 = vpop.f32.mrf.mxu1 }
 0x32c   : > { %v1318_v57 = vpop.f32.mrf.mxu0 }
 0x32d   : > { %v1319_v58 = vadd.f32 %v1318_v57, %v1213_v46  ;;  %v3019_v17 = vadd.f32 %v1367_v25, %v1317_v6  ;;  %v1438_v30 = vmul.f32 %v3017_v11, %v3017_v11  ;;  %v1419_v13 = vadd.f32 %v1418_v29, %v3017_v11 }
 0x32e   : > { %v1322_v0 = vpop.f32.mrf.mxu0 }
 0x32f   : > { %v1323_v10 = vadd.f32 %v1322_v0, %v1217_v40  ;;  %v3029_v32 = vadd.f32 %v1367_v25, %v1319_v58  ;;  %v1439_v26 = vmul.f32 %v3019_v17, %v3019_v17  ;;  %v1406_v40 = vadd.f32 %v1405_v63, %v3010_v47 }
 0x330   : > { %v1324_v33 = vpop.f32.mrf.mxu0  ;;  %v1463_v56 = vadd.f32 %v1462_v41, %v1438_v30 }
 0x331   : > { %v3031_v61 = vadd.f32 %v1372_v16, %v1323_v10  ;;  %v1325_v1 = vadd.f32 %v1324_v33, %v1219_v42  ;;  %v1450_v42 = vadd.f32 %v1449_v27, %v1437_v24  ;;  %v1440_v53 = vmul.f32 %v3029_v32, %v3029_v32  ;;  %v1387_v33 = vpop.permute.xlu1 %1386 }
 0x332   : > { %v1326_v15 = vpop.f32.mrf.mxu0  ;;  %v1407_v50 = vadd.f32 %v1406_v40, %v3019_v17  ;;  %v1420_v57 = vadd.f32 %v1419_v13, %v3029_v32 }
 0x333   : > { %v1327_v28 = vadd.f32 %v1326_v15, %v1221_v48  ;;  %v3043_v46 = vadd.f32 %v1372_v16, %v1325_v1  ;;  %v1441_v23 = vmul.f32 %v3031_v61, %v3031_v61  ;;  %v1382_v48 = vpop.permute.xlu0 %1381  ;;  %v1451_v43 = vadd.f32 %v1450_v42, %v1439_v26  ;;  %v1233_v15 = vpop.f32.mrf.mxu1 }
 0x334   : > { %v1328_v36 = vpop.f32.mrf.mxu0  ;;  %v1464_v58 = vadd.f32 %v1463_v56, %v1440_v53 }
 0x335   : > { %v3047_v12 = vadd.f32 %v1377_v14, %v1327_v28  ;;  %v1329_v52 = vadd.f32 %v1328_v36, %v1223_v7  ;;  %v1442_v60 = vmul.f32 %v3043_v46, %v3043_v46  ;;  %v1408_v7 = vadd.f32 %v1407_v50, %v3031_v61  ;;  %v3092_v41 = vpop.permute.xlu1 %1548 }
 0x336   : > { %v1332_v49 = vpop.f32.mrf.mxu0  ;;  %v1452_v0 = vadd.f32 %v1451_v43, %v1441_v23  ;;  %v1421_v20 = vadd.f32 %v1420_v57, %v3043_v46 }
 0x337   : > { %v3057_v55 = vadd.f32 %v1377_v14, %v1329_v52  ;;  %v1333_v51 = vadd.f32 %v1332_v49, %v1227_v18  ;;  %v1443_v62 = vmul.f32 %v3047_v12, %v3047_v12  ;;  %v1409_v22 = vadd.f32 %v1408_v7, %v3047_v12 }
 0x338   : > { %v1334_v6 = vpop.f32.mrf.mxu0  ;;  %v1465_v1 = vadd.f32 %v1464_v58, %v1442_v60 }
 0x339   : > { %v3065_v25 = vadd.f32 %v1382_v48, %v1333_v51  ;;  %v1444_v54 = vmul.f32 %v3057_v55, %v3057_v55  ;;  %v1335_v10 = vadd.f32 %v1334_v6, %v1229_v31  ;;  %v1453_v59 = vadd.f32 %v1452_v0, %v1443_v62  ;;  %v3100_v6 = vpop.permute.xlu1 %1592 }
 0x33a   : > { %v1336_v18 = vpop.f32.mrf.mxu0  ;;  %v1422_v27 = vadd.f32 %v1421_v20, %v3057_v55 }
 0x33b   : > { %v1445_v16 = vmul.f32 %v3065_v25, %v3065_v25  ;;  %v1337_v24 = vadd.f32 %v1336_v18, %v1231_v34  ;;  %v3075_v8 = vadd.f32 %v1382_v48, %v1335_v10  ;;  %v1410_v14 = vadd.f32 %v1409_v22, %v3065_v25 }
 0x33c   : > { %v1338_v63 = vpop.f32.mrf.mxu0  ;;  %v1466_v29 = vadd.f32 %v1465_v1, %v1444_v54 }
 0x33d   : > { %v3079_v44 = vadd.f32 %v1387_v33, %v1337_v24  ;;  %v1339_v28 = vadd.f32 %v1338_v63, %v1233_v15  ;;  %v1454_v30 = vadd.f32 %v1453_v59, %v1445_v16  ;;  %v1446_v26 = vmul.f32 %v3075_v8, %v3075_v8  ;;  %v3106_v24 = vpop.permute.xlu1 %1536 }
 0x33e   : > { %v1423_v31 = vadd.f32 %v1422_v27, %v3075_v8 }
 0x33f   : > { %v1411_v36 = vadd.f32 %v1410_v14, %v3079_v44  ;;  %v1447_v40 = vmul.f32 %v3079_v44, %v3079_v44  ;;  %v3090_v52 = vadd.f32 %v1387_v33, %v1339_v28  ;;  %v1467_v42 = vadd.f32 %v1466_v29, %v1446_v26 }
 0x341   : > { %v1412_v53 = vrot.slane %v1411_v36, 4  ;;  %v1455_v23 = vadd.f32 %v1454_v30, %v1447_v40  ;;  %v1424_v49 = vadd.f32 %v1423_v31, %v3090_v52  ;;  %v1448_v13 = vmul.f32 %v3090_v52, %v3090_v52  ;;  %v1541_v31 = vpop.permute.xlu1 %1540 }
 0x343   : > { %v1413_v50 = vadd.f32 %v1412_v53, %v1411_v36  ;;  %v1456_v48 = vrot.slane %v1455_v23, 4  ;;  %v1425_v51 = vrot.slane %v1424_v49, 4  ;;  %v1468_v56 = vadd.f32 %v1467_v42, %v1448_v13 }
 0x345   : > { %v1414_v43 = vrot.slane %v1413_v50, 2  ;;  %v1457_v60 = vadd.f32 %v1456_v48, %v1455_v23  ;;  %v1426_v62 = vadd.f32 %v1425_v51, %v1424_v49  ;;  %v1469_v34 = vrot.slane %v1468_v56, 4  ;;  %v1589_v23 = vpop.permute.xlu1 %1588  ;;  %v1545_v49 = vpop.permute.xlu0 %1544 }
 0x347   : > { %v1415_v57 = vadd.f32 %v1414_v43, %v1413_v50  ;;  %v1458_v7 = vrot.slane %v1457_v60, 2  ;;  %v1427_v58 = vrot.slane %v1426_v62, 2  ;;  %v1470_v0 = vadd.f32 %v1469_v34, %v1468_v56 }
 0x349   : > { %v1416_v54 = vrot.slane %v1415_v57, 1  ;;  %v1459_v38 = vadd.f32 %v1458_v7, %v1457_v60  ;;  %v1428_v10 = vadd.f32 %v1427_v58, %v1426_v62  ;;  %v1471_v18 = vrot.slane %v1470_v0, 2  ;;  %v3124_v13 = vpop.permute.xlu1 %1532  ;;  %v1529_v45 = vpop.permute.xlu0 %1528 }
 0x34b   : > { %v1417_v33 = vadd.f32 %v1416_v54, %v1415_v57  ;;  %v1460_v20 = vrot.slane %v1459_v38, 1  ;;  %v1429_v22 = vrot.slane %v1428_v10, 1  ;;  %v1472_v16 = vadd.f32 %v1471_v18, %v1470_v0 }
 0x34d   : > { %v3110_v1 = vmul.f32 0.015625, %v1417_v33  ;;  %v1461_v59 = vadd.f32 %v1460_v20, %v1459_v38  ;;  %v1430_v3 = vadd.f32 %v1429_v22, %v1428_v10  ;;  %v1473_v15 = vrot.slane %v1472_v16, 1  ;;  %v3131_v48 = vpop.permute.xlu1 %1576  ;;  %v1597_v51 = vpop.permute.xlu0 %1596 }
 0x34f   : > { %v1475_v63 = vmul.f32 0.015625, %v1461_v59  ;;  %v1477_v27 = vmul.f32 %v3110_v1, %v3110_v1  ;;  %v3115_v14 = vmul.f32 0.015625, %v1430_v3  ;;  %v1474_v28 = vadd.f32 %v1473_v15, %v1472_v16 }
 0x350   : > { %v1501_v50 = vsub.f32 %v3079_v44, %v3110_v1  ;;  %v1499_v19 = vsub.f32 %v3065_v25, %v3110_v1  ;;  %v1495_v35 = vsub.f32 %v3031_v61, %v3110_v1  ;;  %v1497_v60 = vsub.f32 %v3047_v12, %v3110_v1 }
 0x351   : > { %v1479_v29 = vsub.f32 %v1475_v63, %v1477_v27  ;;  %v1476_v30 = vmul.f32 0.015625, %v1474_v28  ;;  %v1478_v26 = vmul.f32 %v3115_v14, %v3115_v14  ;;  %v1502_v21 = vsub.f32 %v3090_v52, %v3115_v14  ;;  %v1521_v18 = vpop.permute.xlu1 %1520  ;;  %v1585_v33 = vpop.permute.xlu0 %1584 }
 0x352   : > { %v1496_v43 = vsub.f32 %v3043_v46, %v3115_v14  ;;  %v1498_v25 = vsub.f32 %v3057_v55, %v3115_v14  ;;  %v1500_v62 = vsub.f32 %v3075_v8, %v3115_v14  ;;  %v1493_v52 = vsub.f32 %v3019_v17, %v3110_v1 }
 0x353   : > { %v1481_v36 = vmax.f32 %v1479_v29, 0.0  ;;  %v1480_v40 = vsub.f32 %v1476_v30, %v1478_v26  ;;  %v1494_v61 = vsub.f32 %v3029_v32, %v3115_v14  ;;  %v1491_v46 = vsub.f32 %v3010_v47, %v3110_v1 }
 0x354   : > { %v1492_v12 = vsub.f32 %v3017_v11, %v3115_v14  ;;  %v1487_v8 = vsub.f32 %v3006_v9, %v3110_v1  ;;  %v1488_v47 = vsub.f32 %v3012_v2, %v3115_v14  ;;  %v1489_v11 = vsub.f32 %v3003_v5, %v3110_v1 }
 0x355   : > { %v1483_v42 = vadd.f32 1e-05, %v1481_v36  ;;  %v1482_v53 = vmax.f32 %v1480_v40, 0.0  ;;  %v1490_v2 = vsub.f32 %v3008_v39, %v3115_v14 }
 0x357   : > { %2366 = vrsqrt.f32 %v1483_v42  ;;  %v1484_v37 = vadd.f32 1e-05, %v1482_v53 }
 0x359   : > { %2368 = vrsqrt.f32 %v1484_v37 }
 0x364   : > { %v2367_v56 = vpop.eup %2366 }
 0x365   : > { %v1517_v44 = vmul.f32 %v2367_v56, %v1501_v50  ;;  %v1515_v34 = vmul.f32 %v2367_v56, %v1499_v19  ;;  %v1513_v58 = vmul.f32 %v2367_v56, %v1497_v60  ;;  %v1511_v32 = vmul.f32 %v2367_v56, %v1495_v35  ;;  %v1525_v50 = vpop.permute.xlu1 %1524 }
 0x366   : > { %v2369_v57 = vpop.eup %2368  ;;  %v1507_v59 = vmul.f32 %v2367_v56, %v1491_v46  ;;  %v1509_v28 = vmul.f32 %v2367_v56, %v1493_v52  ;;  %v1505_v40 = vmul.f32 %v2367_v56, %v1489_v11 }
 0x367   : > { %v1518_v7 = vmul.f32 %v2369_v57, %v1502_v21  ;;  %v1565_v55 = vmul.f32 %v3092_v41, %v1517_v44  ;;  %v1512_v0 = vmul.f32 %v2369_v57, %v1496_v43  ;;  %v1514_v54 = vmul.f32 %v2369_v57, %v1498_v25 }
 0x368   : > { %v1516_v38 = vmul.f32 %v2369_v57, %v1500_v62  ;;  %v1563_v17 = vmul.f32 %v1545_v49, %v1515_v34  ;;  %v1510_v16 = vmul.f32 %v2369_v57, %v1494_v61  ;;  %v1561_v9 = vmul.f32 %v1541_v31, %v1513_v58 }
 0x369   : > { %v1566_v10 = vmul.f32 %v3092_v41, %v1518_v7  ;;  %v1562_v20 = vmul.f32 %v1541_v31, %v1514_v54  ;;  %v1508_v15 = vmul.f32 %v2369_v57, %v1492_v12  ;;  %v1613_v63 = vadd.f32 %v1597_v51, %v1565_v55  ;;  %v1573_v7 = vpop.permute.xlu1 %1572 }
 0x36a   : > { %v1564_v22 = vmul.f32 %v1545_v49, %v1516_v38  ;;  %v1611_v3 = vadd.f32 %v3100_v6, %v1563_v17  ;;  %v1560_v41 = vmul.f32 %v3106_v24, %v1512_v0  ;;  %v1559_v29 = vmul.f32 %v3106_v24, %v1511_v32 }
 0x36b   : > { %v1610_v5 = vadd.f32 %v1589_v23, %v1562_v20  ;;  %v1556_v1 = vmul.f32 %v1529_v45, %v1508_v15  ;;  %v1614_v30 = vadd.f32 %v1597_v51, %v1566_v10  ;;  %v1558_v26 = vmul.f32 %v3124_v13, %v1510_v16  ;;  %v2357_v15 = vld [vmem:[%s3392_s8 + $0x18] sm:$0xff]  }
 0x36c   : > { %v1612_v27 = vadd.f32 %v3100_v6, %v1564_v22  ;;  %v1503_v31 = vmul.f32 %v2367_v56, %v1487_v8  ;;  %v1504_v36 = vmul.f32 %v2369_v57, %v1488_v47  ;;  %v1609_v42 = vadd.f32 %v1589_v23, %v1561_v9  ;;  %v1581_v6 = vpop.permute.xlu0 %1580  ;;  %v2355_v9 = vld [vmem:[%s3392_s8 + $0x8] sm:$0xff]  }
 0x36d   : > { %v1627_v53 = vmax.f32 %v1611_v3, 0.0  ;;  %v1555_v37 = vmul.f32 %v1529_v45, %v1507_v59  ;;  %v1629_v49 = vmax.f32 %v1613_v63, 0.0  ;;  %v1630_v21 = vmax.f32 %v1614_v30, 0.0  ;;  %v2354_v59 = vld [vmem:[%s3392_s8] sm:$0xff]   ;;  %v2356_v3 = vld [vmem:[%s3392_s8 + $0x10] sm:$0xff]  }
 0x36e   : > { %v1628_v19 = vmax.f32 %v1612_v27, 0.0  ;;  %v1608_v35 = vadd.f32 %v1585_v33, %v1560_v41  ;;  %v1506_v39 = vmul.f32 %v2369_v57, %v1490_v2  ;;  %v1626_v14 = vmax.f32 %v1610_v5, 0.0  ;;  %v2035_v63 = vld [vmem:[%s3395_s11] sm:$0x3]  ;;  %v1663_v2 = vpop.permute.xlu1 %1662 }
 0x36f   : > { %v1557_v24 = vmul.f32 %v3124_v13, %v1509_v28  ;;  %v1604_v51 = vadd.f32 %v3131_v48, %v1556_v1  ;;  %v1607_v43 = vadd.f32 %v1585_v33, %v1559_v29  ;;  %v1552_v60 = vmul.f32 %v1521_v18, %v1504_v36  ;;  %2038 = vperm.xlu1 %2332, %v2035_v63  }
 0x370   : > { %v1624_v44 = vmax.f32 %v1608_v35, 0.0  ;;  %v1554_v25 = vmul.f32 %v1525_v50, %v1506_v39  ;;  %v1606_v56 = vadd.f32 %v1581_v6, %v1558_v26  ;;  %v1625_v23 = vmax.f32 %v1609_v42, 0.0  ;;  %v1569_v55 = vpop.permute.xlu0 %1568 }
 0x371   : > { %v1603_v45 = vadd.f32 %v3131_v48, %v1555_v37  ;;  %v1645_v62 = vpack.c.bf16 %v1629_v49, %v1627_v53  ;;  %v1551_v34 = vmul.f32 %v1521_v18, %v1503_v31  ;;  %v1646_v52 = vpack.c.bf16 %v1630_v21, %v1628_v19 }
 0x372   : > { %v1620_v61 = vmax.f32 %v1604_v51, 0.0  ;;  %v1623_v46 = vmax.f32 %v1607_v43, 0.0  ;;  %v1553_v12 = vmul.f32 %v1525_v50, %v1505_v40  ;;  %v1605_v57 = vadd.f32 %v1581_v6, %v1557_v24 }
 0x373   : > { %v1622_v13 = vmax.f32 %v1606_v56, 0.0  ;;  %v1602_v58 = vadd.f32 %v1573_v7, %v1554_v25  ;;  %v1600_v8 = vadd.f32 %v1569_v55, %v1552_v60  ;;  %1735 = vmatprep.subr.bf16.mxu1 %v1646_v52  ;;  %v1644_v0 = vpack.c.bf16 %v1626_v14, %v1624_v44 }
 0x374   : > { %1736 = vmatpush1.bf16.msra.mxu1 %v1645_v62  ;;  %v1619_v54 = vmax.f32 %v1603_v45, 0.0  ;;  %v1643_v38 = vpack.c.bf16 %v1625_v23, %v1623_v46  ;;  %v1621_v17 = vmax.f32 %v1605_v57, 0.0  ;;  %v1601_v48 = vadd.f32 %v1573_v7, %v1553_v12  ;;  %v1658_v1 = vpop.permute.xlu0 %1657 }
 0x375   : > { %1737 = vmatprep.subr.bf16.mxu1 %v1644_v0  ;;  %v1599_v10 = vadd.f32 %v1569_v55, %v1551_v34  ;;  %v1618_v32 = vmax.f32 %v1602_v58, 0.0  ;;  %v1616_v18 = vmax.f32 %v1600_v8, 0.0  ;;  %v1642_v47 = vpack.c.bf16 %v1622_v13, %v1620_v61 }
 0x376   : > { %v1641_v33 = vpack.c.bf16 %v1621_v17, %v1619_v54  ;;  %v1617_v11 = vmax.f32 %v1601_v48, 0.0 }
 0x377   : > { %v1615_v20 = vmax.f32 %v1599_v10, 0.0  ;;  %v1640_v22 = vpack.c.bf16 %v1618_v32, %v1616_v18 }
 0x378   : > { %1738 = vmatpush1.bf16.msra.mxu1 %v1643_v38  ;;  %v1673_v53 = vpop.permute.xlu0 %1672 }
 0x379   : > { %1739 = vmatprep.subr.bf16.mxu1 %v1642_v47  ;;  %v1639_v16 = vpack.c.bf16 %v1617_v11, %v1615_v20 }
 0x37c   : > { %1740 = vmatpush1.bf16.msra.mxu1 %v1641_v33  ;;  %v1683_v62 = vpop.permute.xlu0 %1682 }
 0x37d   : > { %1741 = vmatprep.subr.bf16.mxu1 %v1640_v22 }
 0x380   : > { %1742 = vmatpush1.bf16.msra.mxu1 %v1639_v16 }
 0x383   : > { %2224 = vmatmul.mubr.msk.bf16.vlgmr.msra.gmra.mxu1 %vm921_vm1, %v2354_v59 }
 0x384   : > { %1769 = vmatprep.mubr.bf16.mxu1 %v2440_v4 }
 0x38b   : > { %2225 = vmatmul.mubr.msk.bf16.gmra.mxu1 %vm921_vm1, %v2355_v9 }
 0x38c   : > { %1779 = vmatprep.mubr.bf16.mxu1 %v2440_v4 }
 0x393   : > { %2226 = vmatmul.mubr.msk.bf16.gmra.mxu1 %vm921_vm1, %v2356_v3 }
 0x394   : > { %1789 = vmatprep.mubr.bf16.mxu1 %v2440_v4  ;;  %v1668_v4 = vpop.permute.xlu1 %1667 }
 0x398   : > { %v1678_v39 = vpop.permute.xlu1 %1677 }
 0x39b   : > { %2227 = vmatmul.mubr.msk.bf16.gmra.mxu1 %vm921_vm1, %v2357_v15 }
 0x39c   : > { %v1688_v48 = vpop.permute.xlu1 %1687 }
 0x443   : > { %v1761_v41 = vpop.f32.mrf.mxu1 }
 0x444   : > { %v3195_v36 = vadd.f32 %v1761_v41, %v1658_v1  ;;  %v1693_v41 = vpop.permute.xlu0 %1692 }
 0x445   : > { %v1763_v27 = vpop.f32.mrf.mxu1 }
 0x446   : > { %v3201_v49 = vadd.f32 %v1763_v27, %v1658_v1  ;;  %v1828_v35 = vmul.f32 %v3195_v36, %v3195_v36 }
 0x447   : > { %v1765_v28 = vpop.f32.mrf.mxu1 }
 0x448   : > { %v3193_v26 = vadd.f32 %v1765_v28, %v1663_v2  ;;  %v1829_v44 = vmul.f32 %v3201_v49, %v3201_v49 }
 0x449   : > { %v1767_v29 = vpop.f32.mrf.mxu1 }
 0x44a   : > { %v3197_v40 = vadd.f32 %v1767_v29, %v1663_v2  ;;  %v1830_v50 = vmul.f32 %v3193_v26, %v3193_v26  ;;  %v1800_v25 = vadd.f32 %v3193_v26, %v3195_v36 }
 0x44b   : > { %v1771_v5 = vpop.f32.mrf.mxu1 }
 0x44c   : > { %v3199_v42 = vadd.f32 %v1771_v5, %v1668_v4  ;;  %v1831_v14 = vmul.f32 %v3197_v40, %v3197_v40  ;;  %v1844_v56 = vadd.f32 %v1830_v50, %v1828_v35  ;;  %v1813_v61 = vadd.f32 %v3197_v40, %v3201_v49 }
 0x44d   : > { %v1773_v30 = vpop.f32.mrf.mxu1 }
 0x44e   : > { %v3205_v6 = vadd.f32 %v1773_v30, %v1668_v4  ;;  %v1832_v24 = vmul.f32 %v3199_v42, %v3199_v42  ;;  %v1801_v46 = vadd.f32 %v1800_v25, %v3199_v42  ;;  %v1857_v57 = vadd.f32 %v1831_v14, %v1829_v44  ;;  %v3270_v14 = vpop.permute.xlu1 %1939 }
 0x44f   : > { %v1775_v31 = vpop.f32.mrf.mxu1 }
 0x450   : > { %v3207_v19 = vadd.f32 %v1775_v31, %v1673_v53  ;;  %v1833_v23 = vmul.f32 %v3205_v6, %v3205_v6  ;;  %v1845_v7 = vadd.f32 %v1844_v56, %v1832_v24  ;;  %v1814_v8 = vadd.f32 %v1813_v61, %v3205_v6 }
 0x451   : > { %v1777_v37 = vpop.f32.mrf.mxu1 }
 0x452   : > { %v3215_v51 = vadd.f32 %v1777_v37, %v1673_v53  ;;  %v1834_v45 = vmul.f32 %v3207_v19, %v3207_v19  ;;  %v1802_v0 = vadd.f32 %v1801_v46, %v3207_v19  ;;  %v1858_v38 = vadd.f32 %v1857_v57, %v1833_v23 }
 0x453   : > { %v1781_v21 = vpop.f32.mrf.mxu1 }
 0x454   : > { %v3217_v43 = vadd.f32 %v1781_v21, %v1678_v39  ;;  %v1835_v55 = vmul.f32 %v3215_v51, %v3215_v51  ;;  %v1846_v17 = vadd.f32 %v1845_v7, %v1834_v45  ;;  %v1815_v47 = vadd.f32 %v1814_v8, %v3215_v51  ;;  %v3275_v7 = vpop.permute.xlu1 %1987 }
 0x455   : > { %v1783_v60 = vpop.f32.mrf.mxu1 }
 0x456   : > { %v3227_v34 = vadd.f32 %v1783_v60, %v1678_v39  ;;  %v1836_v13 = vmul.f32 %v3217_v43, %v3217_v43  ;;  %v1803_v33 = vadd.f32 %v1802_v0, %v3217_v43  ;;  %v1859_v20 = vadd.f32 %v1858_v38, %v1835_v55 }
 0x457   : > { %v1785_v52 = vpop.f32.mrf.mxu1 }
 0x458   : > { %v3232_v12 = vadd.f32 %v1785_v52, %v1683_v62  ;;  %v1837_v10 = vmul.f32 %v3227_v34, %v3227_v34  ;;  %v1847_v22 = vadd.f32 %v1846_v17, %v1836_v13  ;;  %v1816_v9 = vadd.f32 %v1815_v47, %v3227_v34 }
 0x459   : > { %v1787_v58 = vpop.f32.mrf.mxu1 }
 0x45a   : > { %v3240_v54 = vadd.f32 %v1787_v58, %v1683_v62  ;;  %v1838_v32 = vmul.f32 %v3232_v12, %v3232_v12  ;;  %v1804_v3 = vadd.f32 %v1803_v33, %v3232_v12  ;;  %v1860_v27 = vadd.f32 %v1859_v20, %v1837_v10  ;;  %v3277_v33 = vpop.permute.xlu1 %1991 }
 0x45b   : > { %v1791_v18 = vpop.f32.mrf.mxu1 }
 0x45c   : > { %v3248_v11 = vadd.f32 %v1791_v18, %v1688_v48  ;;  %v1839_v16 = vmul.f32 %v3240_v54, %v3240_v54  ;;  %v1848_v28 = vadd.f32 %v1847_v22, %v1838_v32  ;;  %v1817_v29 = vadd.f32 %v1816_v9, %v3240_v54 }
 0x45d   : > { %v1793_v59 = vpop.f32.mrf.mxu1 }
 0x45e   : > { %v1840_v15 = vmul.f32 %v3248_v11, %v3248_v11  ;;  %v3256_v63 = vadd.f32 %v1793_v59, %v1688_v48  ;;  %v1805_v5 = vadd.f32 %v1804_v3, %v3248_v11  ;;  %v1861_v4 = vadd.f32 %v1860_v27, %v1839_v16 }
 0x45f   : > { %v1795_v2 = vpop.f32.mrf.mxu1 }
 0x460   : > { %v1841_v1 = vmul.f32 %v3256_v63, %v3256_v63  ;;  %v3262_v30 = vadd.f32 %v1795_v2, %v1693_v41  ;;  %v1849_v31 = vadd.f32 %v1848_v28, %v1840_v15  ;;  %v1818_v37 = vadd.f32 %v1817_v29, %v3256_v63  ;;  %v1936_v29 = vpop.permute.xlu1 %1935 }
 0x461   : > { %v1797_v53 = vpop.f32.mrf.mxu1 }
 0x462   : > { %v1806_v50 = vadd.f32 %v1805_v5, %v3262_v30  ;;  %v1842_v21 = vmul.f32 %v3262_v30, %v3262_v30  ;;  %v3268_v35 = vadd.f32 %v1797_v53, %v1693_v41  ;;  %v1862_v39 = vadd.f32 %v1861_v4, %v1841_v1 }
 0x464   : > { %v1807_v24 = vrot.slane %v1806_v50, 4  ;;  %v1850_v60 = vadd.f32 %v1849_v31, %v1842_v21  ;;  %v1819_v44 = vadd.f32 %v1818_v37, %v3268_v35  ;;  %v1843_v25 = vmul.f32 %v3268_v35, %v3268_v35  ;;  %v1984_v37 = vpop.permute.xlu1 %1983 }
 0x466   : > { %v1808_v56 = vadd.f32 %v1807_v24, %v1806_v50  ;;  %v1851_v23 = vrot.slane %v1850_v60, 4  ;;  %v1820_v45 = vrot.slane %v1819_v44, 4  ;;  %v1863_v62 = vadd.f32 %v1862_v39, %v1843_v25  ;;  %v3287_v50 = vpop.permute.xlu0 %1979 }
 0x468   : > { %v1809_v52 = vrot.slane %v1808_v56, 2  ;;  %v1852_v61 = vadd.f32 %v1851_v23, %v1850_v60  ;;  %v1821_v46 = vadd.f32 %v1820_v45, %v1819_v44  ;;  %v1864_v57 = vrot.slane %v1863_v62, 4  ;;  %v1924_v21 = vpop.permute.xlu1 %1923 }
 0x46a   : > { %v1810_v55 = vadd.f32 %v1809_v52, %v1808_v56  ;;  %v1853_v13 = vrot.slane %v1852_v61, 2  ;;  %v1822_v58 = vrot.slane %v1821_v46, 2  ;;  %v1865_v8 = vadd.f32 %v1864_v57, %v1863_v62  ;;  %v1944_v39 = vpop.permute.xlu0 %1943 }
 0x46c   : > { %v1811_v0 = vrot.slane %v1810_v55, 1  ;;  %v1854_v38 = vadd.f32 %v1853_v13, %v1852_v61  ;;  %v1823_v17 = vadd.f32 %v1822_v58, %v1821_v46  ;;  %v1866_v48 = vrot.slane %v1865_v8, 2  ;;  %v3295_v25 = vpop.permute.xlu1 %1971 }
 0x46e   : > { %v1812_v10 = vadd.f32 %v1811_v0, %v1810_v55  ;;  %v1855_v32 = vrot.slane %v1854_v38, 1  ;;  %v1824_v18 = vrot.slane %v1823_v17, 1  ;;  %v1867_v47 = vadd.f32 %v1866_v48, %v1865_v8  ;;  %v1932_v56 = vpop.permute.xlu0 %1931 }
 0x470   : > { %v3279_v20 = vmul.f32 0.015625, %v1812_v10  ;;  %v1856_v22 = vadd.f32 %v1855_v32, %v1854_v38  ;;  %v1825_v16 = vadd.f32 %v1824_v18, %v1823_v17  ;;  %v1868_v59 = vrot.slane %v1867_v47, 1  ;;  %v1976_v32 = vpop.permute.xlu1 %1975 }
 0x472   : > { %v1870_v9 = vmul.f32 0.015625, %v1856_v22  ;;  %v1872_v3 = vmul.f32 %v3279_v20, %v3279_v20  ;;  %v3283_v15 = vmul.f32 0.015625, %v1825_v16  ;;  %v1869_v41 = vadd.f32 %v1868_v59, %v1867_v47  ;;  %v1928_v18 = vpop.permute.xlu0 %1927 }
 0x473   : > { %v1896_v24 = vsub.f32 %v3262_v30, %v3279_v20  ;;  %v1894_v60 = vsub.f32 %v3248_v11, %v3279_v20  ;;  %v1892_v45 = vsub.f32 %v3232_v12, %v3279_v20  ;;  %v1886_v62 = vsub.f32 %v3199_v42, %v3279_v20 }
 0x474   : > { %v1874_v27 = vsub.f32 %v1870_v9, %v1872_v3  ;;  %v1873_v28 = vmul.f32 %v3283_v15, %v3283_v15  ;;  %v1871_v2 = vmul.f32 0.015625, %v1869_v41  ;;  %v1897_v30 = vsub.f32 %v3268_v35, %v3283_v15 }
 0x475   : > { %v1895_v11 = vsub.f32 %v3256_v63, %v3283_v15  ;;  %v1893_v61 = vsub.f32 %v3240_v54, %v3283_v15  ;;  %v1887_v46 = vsub.f32 %v3205_v6, %v3283_v15  ;;  %v1890_v13 = vsub.f32 %v3217_v43, %v3279_v20 }
 0x476   : > { %v1876_v5 = vmax.f32 %v1874_v27, 0.0  ;;  %v1875_v1 = vsub.f32 %v1871_v2, %v1873_v28  ;;  %v1891_v63 = vsub.f32 %v3227_v34, %v3283_v15  ;;  %v1888_v54 = vsub.f32 %v3207_v19, %v3279_v20 }
 0x477   : > { %v1889_v6 = vsub.f32 %v3215_v51, %v3283_v15  ;;  %v1884_v38 = vsub.f32 %v3193_v26, %v3279_v20  ;;  %v1885_v19 = vsub.f32 %v3197_v40, %v3283_v15  ;;  %v1882_v51 = vsub.f32 %v3195_v36, %v3279_v20 }
 0x478   : > { %v1878_v4 = vadd.f32 1e-05, %v1876_v5  ;;  %v1877_v31 = vmax.f32 %v1875_v1, 0.0  ;;  %v1883_v16 = vsub.f32 %v3201_v49, %v3283_v15  ;;  %v1916_v15 = vpop.permute.xlu0 %1915 }
 0x47a   : > { %2370 = vrsqrt.f32 %v1878_v4  ;;  %v1879_v53 = vadd.f32 1e-05, %v1877_v31  ;;  %v1920_v31 = vpop.permute.xlu1 %1919 }
 0x47c   : > { %2372 = vrsqrt.f32 %v1879_v53 }
 0x487   : > { %v3293_v44 = vpop.eup %2370 }
 0x488   : > { %v1910_v23 = vmul.f32 %v3293_v44, %v1894_v60  ;;  %v1912_v52 = vmul.f32 %v3293_v44, %v1896_v24  ;;  %v1908_v55 = vmul.f32 %v3293_v44, %v1892_v45  ;;  %v1906_v10 = vmul.f32 %v3293_v44, %v1890_v13 }
 0x489   : > { %v2373_v57 = vpop.eup %2372  ;;  %v1902_v34 = vmul.f32 %v3293_v44, %v1886_v62  ;;  %v1904_v40 = vmul.f32 %v3293_v44, %v1888_v54  ;;  %v1900_v36 = vmul.f32 %v3293_v44, %v1884_v38 }
 0x48a   : > { %v1958_v12 = vmul.f32 %v3270_v14, %v1910_v23  ;;  %v1960_v42 = vmul.f32 %v1944_v39, %v1912_v52  ;;  %v1911_v58 = vmul.f32 %v2373_v57, %v1895_v11  ;;  %v1909_v35 = vmul.f32 %v2373_v57, %v1893_v61 }
 0x48b   : > { %v1903_v8 = vmul.f32 %v2373_v57, %v1887_v46  ;;  %v1913_v0 = vmul.f32 %v2373_v57, %v1897_v30  ;;  %v1956_v47 = vmul.f32 %v1936_v29, %v1908_v55  ;;  %v1907_v3 = vmul.f32 %v2373_v57, %v1891_v63 }
 0x48c   : > { %v1959_v17 = vmul.f32 %v3270_v14, %v1911_v58  ;;  %v1957_v48 = vmul.f32 %v1936_v29, %v1909_v35  ;;  %v2006_v22 = vadd.f32 %v3275_v7, %v1958_v12  ;;  %v2008_v14 = vadd.f32 %v3277_v33, %v1960_v42  ;;  %v1968_v58 = vpop.permute.xlu1 %1967  ;;  %v1964_v35 = vpop.permute.xlu0 %1963 }
 0x48d   : > { %v1961_v43 = vmul.f32 %v1944_v39, %v1913_v0  ;;  %v1951_v26 = vmul.f32 %v1924_v21, %v1903_v8  ;;  %v1905_v41 = vmul.f32 %v2373_v57, %v1889_v6  ;;  %v1954_v28 = vmul.f32 %v1932_v56, %v1906_v10 }
 0x48e   : > { %v2007_v59 = vadd.f32 %v3275_v7, %v1959_v17  ;;  %v2005_v27 = vadd.f32 %v1984_v37, %v1957_v48  ;;  %v2004_v20 = vadd.f32 %v1984_v37, %v1956_v47  ;;  %v1950_v2 = vmul.f32 %v1924_v21, %v1902_v34 }
 0x48f   : > { %v2009_v9 = vadd.f32 %v3277_v33, %v1961_v43  ;;  %v1955_v29 = vmul.f32 %v1932_v56, %v1907_v3  ;;  %v1953_v5 = vmul.f32 %v1928_v18, %v1905_v41  ;;  %v2022_v1 = vmax.f32 %v2006_v22, 0.0 }
 0x490   : > { %v2024_v4 = vmax.f32 %v2008_v14, 0.0  ;;  %v1901_v49 = vmul.f32 %v2373_v57, %v1885_v19  ;;  %v1899_v7 = vmul.f32 %v2373_v57, %v1883_v16  ;;  %v2023_v53 = vmax.f32 %v2007_v59, 0.0  ;;  %v2026_v19 = vld [vmem:[%s3394_s10] sm:$0x1] }
 0x491   : > { %v2025_v33 = vmax.f32 %v2009_v9, 0.0  ;;  %v1999_v39 = vadd.f32 %v3295_v25, %v1951_v26  ;;  %v2003_v24 = vadd.f32 %v3287_v50, %v1955_v29  ;;  %v2021_v60 = vmax.f32 %v2005_v27, 0.0 }
 0x492   : > { %v2002_v23 = vadd.f32 %v3287_v50, %v1954_v28  ;;  %v1952_v45 = vmul.f32 %v1928_v18, %v1904_v40  ;;  %v1898_v37 = vmul.f32 %v3293_v44, %v1882_v51  ;;  %v2001_v56 = vadd.f32 %v1976_v32, %v1953_v5  ;;  %v2039_v51 = vpop.permute.xlu1 %2038 }
 0x493   : > { %v2019_v21 = vmax.f32 %v2003_v24, 0.0  ;;  %v1949_v62 = vmul.f32 %v1920_v31, %v1901_v49  ;;  %v1947_v52 = vmul.f32 %v1916_v15, %v1899_v7  ;;  %v1998_v30 = vadd.f32 %v3295_v25, %v1950_v2 }
 0x494   : > { %v2020_v11 = vmax.f32 %v2004_v20, 0.0  ;;  %v2033_v61 = vpack.c.bf16 %v2024_v4, %v2022_v1  ;;  %v2015_v46 = vmax.f32 %v1999_v39, 0.0  ;;  %v2034_v57 = vpack.c.bf16 %v2025_v33, %v2023_v53 }
 0x495   : > { %v2018_v12 = vmax.f32 %v2002_v23, 0.0  ;;  %v2000_v55 = vadd.f32 %v1976_v32, %v1952_v45  ;;  %v1948_v42 = vmul.f32 %v1920_v31, %v1900_v36  ;;  %v1946_v13 = vmul.f32 %v1916_v15, %v1898_v37 }
 0x496   : > { %v2017_v50 = vmax.f32 %v2001_v56, 0.0  ;;  %v1997_v8 = vadd.f32 %v1968_v58, %v1949_v62  ;;  %v1995_v0 = vadd.f32 %v1964_v35, %v1947_v52  ;;  %2052 = vmatprep.subr.bf16.mxu0 %v2034_v57  ;;  %v2032_v44 = vpack.c.bf16 %v2021_v60, %v2019_v21 }
 0x497   : > { %2053 = vmatpush1.bf16.msra.mxu0 %v2033_v61  ;;  %v2014_v63 = vmax.f32 %v1998_v30, 0.0  ;;  %v2031_v54 = vpack.c.bf16 %v2020_v11, %v2018_v12  ;;  %v2016_v25 = vmax.f32 %v2000_v55, 0.0  ;;  %v1996_v6 = vadd.f32 %v1968_v58, %v1948_v42 }
 0x498   : > { %2054 = vmatprep.subr.bf16.mxu0 %v2032_v44  ;;  %v1994_v38 = vadd.f32 %v1964_v35, %v1946_v13  ;;  %v2013_v17 = vmax.f32 %v1997_v8, 0.0  ;;  %v2011_v48 = vmax.f32 %v1995_v0, 0.0  ;;  %v2030_v43 = vpack.c.bf16 %v2017_v50, %v2015_v46 }
 0x499   : > { %v2029_v10 = vpack.c.bf16 %v2016_v25, %v2014_v63  ;;  %v2012_v32 = vmax.f32 %v1996_v6, 0.0 }
 0x49a   : > { %v2010_v18 = vmax.f32 %v1994_v38, 0.0  ;;  %v2028_v47 = vpack.c.bf16 %v2013_v17, %v2011_v48 }
 0x49b   : > { %2055 = vmatpush1.bf16.msra.mxu0 %v2031_v54 }
 0x49c   : > { %2056 = vmatprep.subr.bf16.mxu0 %v2030_v43  ;;  %v2027_v34 = vpack.c.bf16 %v2012_v32, %v2010_v18 }
 0x49f   : > { %2057 = vmatpush1.bf16.msra.mxu0 %v2029_v10 }
 0x4a0   : > { %2058 = vmatprep.subr.bf16.mxu0 %v2028_v47 }
 0x4a3   : > { %2059 = vmatpush1.bf16.msra.mxu0 %v2027_v34 }
 0x4a6   : > { %2228 = vmatmul.mubr.msk.bf16.vlgmr.msra.gmra.mxu0 %vm921_vm1, %v2026_v19 }
 0x566   : > { %v2078_v22 = vpop.f32.mrf.mxu0 }
 0x567   : > { %v2079_v26 = vadd.f32 %v2078_v22, %v2039_v51 }
 0x568   : > { %v2080_v14 = vpop.f32.mrf.mxu0 }
 0x569   : > { %v2081_v16 = vadd.f32 %v2080_v14, %v2039_v51  ;;  %2374 = vtanh.f32 %v2079_v26 }
 0x56a   : > { %v2082_v59 = vpop.f32.mrf.mxu0 }
 0x56b   : > { %2376 = vtanh.f32 %v2081_v16 }
 0x56c   : > { %v2083_v9 = vpop.f32.mrf.mxu0 }
 0x576   : > { %v2375_v3 = vpop.eup %2374 }
 0x578   : > { %v2377_v41 = vpop.eup %2376 }
 0x579   : > { %v2089_v27 = vcombine.low %v2375_v3, %v2377_v41 }
 0x57b   : > { %2229 = vst.sshfl [vmem:[%s459_s15] sm:$0x33 pattern:$0x76325410] %v2089_v27 }
 0x57c   : > { %2391 = shalt.err (!%p2388_p5)
}
 0x57d   : > { %s2392_s25 = scalar_lea.hbm %s2112_s19, 64  ;;  %s2396_s15 = scalar_lea.hbm %s3396_s12, 128 }
 0x57e   : > { %p2393_p7 = scmp.ne.s32.totalorder %s2112_s19, %s2392_s25  ;;  %p2397_p12 = scmp.lt.s32.totalorder %s2112_s19, %s3396_s12 }
 0x57f   : > { %p2398_p13 = scmp.lt.s32.totalorder %s2396_s15, %s2392_s25 }
 0x580   : > { %p2394_p10 = pnand %p2393_p7, %p2547_p6 }
 0x581   : > { %p2399_p0 = por %p2398_p13, %p2397_p12 }
 0x582   : > { %p2395_p11 = pneg %p2394_p10 }
 0x584   : > { %p2400_p9 = pnand %p2399_p0, %p2395_p11 }
 0x586   : > { %2403 = shalt.err (!%p2400_p9)
}
 0x587   : > { %2245 = dma.vmem_to_hbm [thread:$0]  (%p2547_p6), %s2115_s16, 64, %s2112_s19, %s2100_s20  }
 0x588 PF: > { %s2126_s1 = sand.u32 1, %s2426_s21   ;;  %p3408_p1 = scmp.ge.s32.totalorder %s2438_s24, 2 }
 0x589   : > { %s2127_s2 = scalar_lea.sflag [#allocation4], %s2126_s1 }
 0x58a   : > { %p2248_p2 = pnand %p3408_p1, %p2551_p8 }
 0x58c   : > { %p2249_p3 = pneg %p2248_p2 }
 0x58e   : > { %2421 = dma.done.wait (%p2249_p3), %s2127_s2, 64  }
 0x58f   : > { %2423 = vsyncadd (%p2249_p3), %s2127_s2, 4294967232  ;;  %p22_p9 = scmp.ge.s32.totalorder %s2532_s27, 4   ;;  %s3409_s21 = smov %s2430_s22 }
 0x590   : > { %s3410_s22 = smov %s2434_s23  ;;  %s3411_s23 = smov %s2545_s30 }
 0x591   : > { %s3412_s24 = smov %s2532_s27  ;;  %24 = sbr.rel (!%p22_p9) target bundleno = 7 (0x7), region = 146 }
 0x596   :  { %2132 = vsyncpa [#allocation4], 1 }
 0x597   :  { %2134 = vsyncpa [#allocation4 + $0x1], 1 }

</bundles_post_ra>
